<compile_context>
chip_gen: v7x
topology: tpu7x:2x2x1
jax: 0.10.0
libtpu: 0.0.40
codegen_flags: <defaults>
</compile_context>

<pallas_src>
import jax
import jax.numpy as jnp
from jax.experimental import pallas as pl
from jax.experimental.pallas import tpu as pltpu


def residual_ff_kernel(x_ref, w1_ref, b1_ref, w2_ref, b2_ref, o_ref):
    # x_ref: (tm, Dp) bf16 token tile; weights are full resident blocks.
    x = x_ref[...]                                        # bf16 MXU operand
    h = jnp.dot(x, w1_ref[...], preferred_element_type=jnp.float32)
    h = h + b1_ref[...]                                   # f32 bias
    h = jax.nn.gelu(h, approximate=True)                  # f32 elementwise (VPU/EUP)
    y = jnp.dot(h.astype(w2_ref.dtype), w2_ref[...],      # back to bf16 for MXU
                preferred_element_type=jnp.float32)
    y = y + b2_ref[...]
    # Residual add in f32, single cast on the way out.
    o_ref[...] = (y + x.astype(jnp.float32)).astype(o_ref.dtype)


def _pad_axis(a, axis, multiple):
    pad = (-a.shape[axis]) % multiple
    if pad == 0:
        return a
    widths = [(0, 0)] * a.ndim
    widths[axis] = (0, pad)
    return jnp.pad(a, widths)


def _pick_tm(M, Dp, Hp):
    """Largest token tile (<=512 rows, multiple of 8) fitting a ~40 MiB VMEM
    budget (conservative for v7x's 64 MiB VMEM; v5e/v6e have 128 MiB so the
    same choice is safe), while keeping >=2 grid steps so the token axis can
    shard across v7x's two TensorCores."""
    budget = 40 * (1 << 20)
    # Resident weights + biases (default double-buffered, weights bf16).
    fixed = 2 * 2 * (Dp * Hp + Hp * Dp) + 2 * 4 * (Hp + Dp)
    avail = max(budget - fixed, 1 << 21)
    # Per-token-row bytes: x (2 bufs, bf16) + out (2 bufs, bf16) + f32 h + f32 y.
    per_row = 2 * 2 * Dp + 2 * 2 * Dp + 4 * Hp + 4 * Dp
    tm = min(512, max(8, avail // per_row))
    if M >= 16:
        tm = min(tm, M // 2)          # keep >=2 grid steps (megacore / dual-TC)
    tm = max(8, (int(tm) // 8) * 8)
    return tm


def residual_ff(x, w1, b1, w2, b2, *, tm=None):
    """x: (B, N, D) -> (B, N, D); computes FeedForward(x) + x fused in one kernel."""
    B, N, D = x.shape
    H = w1.shape[1]
    M = B * N

    # Lane-dense padding: feature dims to multiples of 128. Zero padding is
    # exact (padded D columns / H units contribute 0) and is sliced off below.
    x2d = _pad_axis(x.reshape(M, D), 1, 128)
    w1p = _pad_axis(_pad_axis(w1, 0, 128), 1, 128)
    b1p = _pad_axis(b1, 1, 128)
    w2p = _pad_axis(_pad_axis(w2, 0, 128), 1, 128)
    b2p = _pad_axis(b2, 1, 128)
    Dp = x2d.shape[1]
    Hp = w1p.shape[1]

    if tm is None:
        tm = _pick_tm(M, Dp, Hp)
    grid_m = pl.cdiv(M, tm)
    Mp = grid_m * tm
    x2d = _pad_axis(x2d, 0, tm)

    flops = 2 * Mp * Dp * Hp * 2                      # two matmuls
    bytes_accessed = (2 * Mp * Dp * x2d.dtype.itemsize          # x in + out
                      + 2 * Dp * Hp * w1p.dtype.itemsize        # W1 + W2
                      + 4 * (Hp + Dp))                          # biases

    out2d = pl.pallas_call(
        residual_ff_kernel,
        out_shape=jax.ShapeDtypeStruct((Mp, Dp), x.dtype),
        grid_spec=pltpu.PrefetchScalarGridSpec(
            num_scalar_prefetch=0,
            grid=(grid_m,),
            in_specs=[
                pl.BlockSpec((tm, Dp), lambda i: (i, 0)),   # x tile
                pl.BlockSpec((Dp, Hp), lambda i: (0, 0)),   # W1 (resident full block)
                pl.BlockSpec((1, Hp), lambda i: (0, 0)),    # b1
                pl.BlockSpec((Hp, Dp), lambda i: (0, 0)),   # W2 (resident full block)
                pl.BlockSpec((1, Dp), lambda i: (0, 0)),    # b2
            ],
            out_specs=pl.BlockSpec((tm, Dp), lambda i: (i, 0)),
        ),
        compiler_params=pltpu.CompilerParams(
            dimension_semantics=("parallel",),
            vmem_limit_bytes=48 * (1 << 20),
        ),
        cost_estimate=pl.CostEstimate(
            flops=flops,
            transcendentals=Mp * Hp,       # tanh in GELU
            bytes_accessed=bytes_accessed,
        ),
    )(x2d, w1p, b1p, w2p, b2p)
    return out2d[:M, :D].reshape(B, N, D)


def residual_ff_ref(x, w1, b1, w2, b2):
    """Pure-JAX reference of fn(x) + x with the same bf16-operand / f32-acc math."""
    B, N, D = x.shape
    x2 = x.reshape(-1, D)
    h = jnp.dot(x2, w1, preferred_element_type=jnp.float32) + b1
    h = jax.nn.gelu(h, approximate=True)
    y = jnp.dot(h.astype(w2.dtype), w2, preferred_element_type=jnp.float32) + b2
    return (y + x2.astype(jnp.float32)).astype(x.dtype).reshape(B, N, D)


if __name__ == "__main__":
    key = jax.random.PRNGKey(0)
    k_x, k_w1, k_b1, k_w2, k_b2 = jax.random.split(key, 5)

    # Small transformer FeedForward shapes, 128-aligned so MXU tiles / lanes are full.
    B, N, D, H = 2, 128, 256, 512
    x = jax.random.normal(k_x, (B, N, D), dtype=jnp.float32).astype(jnp.bfloat16)
    w1 = (jax.random.normal(k_w1, (D, H), dtype=jnp.float32) * 0.02).astype(jnp.bfloat16)
    b1 = jax.random.normal(k_b1, (1, H), dtype=jnp.float32) * 0.02
    w2 = (jax.random.normal(k_w2, (H, D), dtype=jnp.float32) * 0.02).astype(jnp.bfloat16)
    b2 = jax.random.normal(k_b2, (1, D), dtype=jnp.float32) * 0.02

    out = residual_ff(x, w1, b1, w2, b2)
    out = jax.block_until_ready(out)

    ref = residual_ff_ref(x, w1, b1, w2, b2)
    assert out.shape == x.shape and out.dtype == x.dtype
    ok = jnp.allclose(out.astype(jnp.float32), ref.astype(jnp.float32),
                      atol=2e-2, rtol=2e-2)
    assert bool(ok), "mismatch vs reference"

    print("KERNEL_OK")
</pallas_src>

<mosaic_0001>
module attributes {stable_mosaic.version = 11 : i64} {
  func.func @residual_ff_kernel(%arg0: i32, %arg1: memref<128x256xbf16, #tpu.memory_space<vmem>>, %arg2: memref<256x512xbf16, #tpu.memory_space<vmem>>, %arg3: memref<1x512xf32, #tpu.memory_space<vmem>>, %arg4: memref<512x256xbf16, #tpu.memory_space<vmem>>, %arg5: memref<1x256xf32, #tpu.memory_space<vmem>>, %arg6: memref<128x256xbf16, #tpu.memory_space<vmem>>) attributes {dimension_semantics = [#tpu.dimension_semantics<parallel>], iteration_bounds = array<i64: 2>, scalar_prefetch = 0 : i64, scratch_operands = 0 : i64, tpu.core_type = #tpu.core_type<tc>, window_params = [{transform_indices = @transform_0, window_bounds = array<i64: 128, 256>}, {pipeline_mode = #tpu.pipeline_mode<synchronous>, transform_indices = @transform_1, window_bounds = array<i64: 256, 512>}, {pipeline_mode = #tpu.pipeline_mode<synchronous>, transform_indices = @transform_2, window_bounds = array<i64: 1, 512>}, {pipeline_mode = #tpu.pipeline_mode<synchronous>, transform_indices = @transform_3, window_bounds = array<i64: 512, 256>}, {pipeline_mode = #tpu.pipeline_mode<synchronous>, transform_indices = @transform_4, window_bounds = array<i64: 1, 256>}, {transform_indices = @transform_5, window_bounds = array<i64: 128, 256>}]} {
    %c0 = arith.constant 0 : index
    %c0_0 = arith.constant 0 : index
    %0 = vector.load %arg1[%c0, %c0_0] : memref<128x256xbf16, #tpu.memory_space<vmem>>, vector<128x256xbf16>
    %c0_1 = arith.constant 0 : index
    %c0_2 = arith.constant 0 : index
    %1 = vector.load %arg2[%c0_1, %c0_2] : memref<256x512xbf16, #tpu.memory_space<vmem>>, vector<256x512xbf16>
    %cst = arith.constant dense<0.000000e+00> : vector<128x512xf32>
    %2 = tpu.matmul %0, %1, %cst {dimension_numbers = #tpu.dot_dimension_numbers<[1], [0], [0], [1], [0, 0, 1, 1], [], []>} : vector<128x256xbf16>, vector<256x512xbf16>, vector<128x512xf32> -> vector<128x512xf32>
    %c0_3 = arith.constant 0 : index
    %c0_4 = arith.constant 0 : index
    %3 = vector.load %arg3[%c0_3, %c0_4] : memref<1x512xf32, #tpu.memory_space<vmem>>, vector<1x512xf32>
    %4 = vector.broadcast %3 : vector<1x512xf32> to vector<128x512xf32>
    %5 = arith.addf %2, %4 : vector<128x512xf32>
    %6 = arith.mulf %5, %5 : vector<128x512xf32>
    %7 = arith.mulf %5, %6 : vector<128x512xf32>
    %cst_5 = arith.constant 4.471500e-02 : f32
    %8 = vector.broadcast %cst_5 : f32 to vector<128x512xf32>
    %9 = arith.mulf %8, %7 : vector<128x512xf32>
    %10 = arith.addf %5, %9 : vector<128x512xf32>
    %cst_6 = arith.constant 0.797884583 : f32
    %11 = vector.broadcast %cst_6 : f32 to vector<128x512xf32>
    %12 = arith.mulf %11, %10 : vector<128x512xf32>
    %13 = math.tanh %12 : vector<128x512xf32>
    %cst_7 = arith.constant 1.000000e+00 : f32
    %14 = vector.broadcast %cst_7 : f32 to vector<128x512xf32>
    %15 = arith.addf %14, %13 : vector<128x512xf32>
    %cst_8 = arith.constant 5.000000e-01 : f32
    %16 = vector.broadcast %cst_8 : f32 to vector<128x512xf32>
    %17 = arith.mulf %16, %15 : vector<128x512xf32>
    %18 = arith.mulf %5, %17 : vector<128x512xf32>
    %19 = arith.truncf %18 : vector<128x512xf32> to vector<128x512xbf16>
    %c0_9 = arith.constant 0 : index
    %c0_10 = arith.constant 0 : index
    %20 = vector.load %arg4[%c0_9, %c0_10] : memref<512x256xbf16, #tpu.memory_space<vmem>>, vector<512x256xbf16>
    %cst_11 = arith.constant dense<0.000000e+00> : vector<128x256xf32>
    %21 = tpu.matmul %19, %20, %cst_11 {dimension_numbers = #tpu.dot_dimension_numbers<[1], [0], [0], [1], [0, 0, 1, 1], [], []>} : vector<128x512xbf16>, vector<512x256xbf16>, vector<128x256xf32> -> vector<128x256xf32>
    %c0_12 = arith.constant 0 : index
    %c0_13 = arith.constant 0 : index
    %22 = vector.load %arg5[%c0_12, %c0_13] : memref<1x256xf32, #tpu.memory_space<vmem>>, vector<1x256xf32>
    %23 = vector.broadcast %22 : vector<1x256xf32> to vector<128x256xf32>
    %24 = arith.addf %21, %23 : vector<128x256xf32>
    %25 = arith.extf %0 : vector<128x256xbf16> to vector<128x256xf32>
    %26 = arith.addf %24, %25 : vector<128x256xf32>
    %27 = arith.truncf %26 : vector<128x256xf32> to vector<128x256xbf16>
    %c0_14 = arith.constant 0 : index
    %c0_15 = arith.constant 0 : index
    %28 = vector.load %arg6[%c0_14, %c0_15] : memref<128x256xbf16, #tpu.memory_space<vmem>>, vector<128x256xbf16>
    tpu.vector_store %arg6[%c0_14, %c0_15], %27 {strides = array<i32>} : memref<128x256xbf16, #tpu.memory_space<vmem>>, vector<128x256xbf16>,
    return
  }
  func.func @transform_0(%arg0: i32) -> (i32, i32) {
    %c0_i32 = arith.constant 0 : i32
    %c0_i32_0 = arith.constant 0 : i32
    return %arg0, %c0_i32 : i32, i32
  }
  func.func @transform_1(%arg0: i32) -> (i32, i32) {
    %c0_i32 = arith.constant 0 : i32
    %c0_i32_0 = arith.constant 0 : i32
    %c0_i32_1 = arith.constant 0 : i32
    return %c0_i32, %c0_i32_0 : i32, i32
  }
  func.func @transform_2(%arg0: i32) -> (i32, i32) {
    %c0_i32 = arith.constant 0 : i32
    %c0_i32_0 = arith.constant 0 : i32
    %c0_i32_1 = arith.constant 0 : i32
    return %c0_i32, %c0_i32_0 : i32, i32
  }
  func.func @transform_3(%arg0: i32) -> (i32, i32) {
    %c0_i32 = arith.constant 0 : i32
    %c0_i32_0 = arith.constant 0 : i32
    %c0_i32_1 = arith.constant 0 : i32
    return %c0_i32, %c0_i32_0 : i32, i32
  }
  func.func @transform_4(%arg0: i32) -> (i32, i32) {
    %c0_i32 = arith.constant 0 : i32
    %c0_i32_0 = arith.constant 0 : i32
    %c0_i32_1 = arith.constant 0 : i32
    return %c0_i32, %c0_i32_0 : i32, i32
  }
  func.func @transform_5(%arg0: i32) -> (i32, i32) {
    %c0_i32 = arith.constant 0 : i32
    %c0_i32_0 = arith.constant 0 : i32
    return %arg0, %c0_i32 : i32, i32
  }
}

</mosaic_0001>

<bundles_post_ra>
// kernel: tpu_custom_call.1
= control target key start
LH: loop header
LB: loop body
LE: loop exit
PB: predicated region body
PF: predicated region fallthrough
CT: control target
= control target key end

     0   :  { %10 = vsyncpa [#allocation3], 0  ;;  %s4591_s0 = inlined_call_operand.hbm [shape: bf16[256,256], index: 0, kind: input, shape index: {}]   ;;  %s4592_s1 = inlined_call_operand.hbm [shape: bf16[256,512], index: 1, kind: input, shape index: {}]   ;;  %s4593_s2 = inlined_call_operand.vmem [shape: f32[1,512], index: 2, kind: input, shape index: {}]   ;;  %s4594_s3 = inlined_call_operand.hbm [shape: bf16[512,256], index: 3, kind: input, shape index: {}]   ;;  %s4595_s4 = inlined_call_operand.vmem [shape: f32[1,256], index: 4, kind: input, shape index: {}]   ;;  %s4596_s5 = inlined_call_operand.hbm [shape: bf16[256,256], index: 5, kind: output, shape index: {}]  }
   0x1   :  { %12 = vsyncpa [#allocation3 + $0x1], 0 }
   0x2   :  { %13 = vsyncpa [#allocation6], 0 }
   0x3   :  { %14 = vsyncpa [#allocation4], 0 }
   0x4   :  { %16 = vsyncpa [#allocation4 + $0x1], 0  ;;  %s3403_s18 = smov 0   ;;  %s3405_s19 = smov 0  }
   0x5   :  { %s3407_s20 = smov 0   ;;  %s3409_s21 = smov 0  }
   0x6 LB: > { %s3424_s22 = sadd.s32 4294967295, %s3361_s21   ;;  %s2516_s23 = sadd.s32 4294967294, %s3361_s21   ;;  %s3361_s21 = sphi %s3409_s21, %s4616_s21   ;;  %s3357_s20 = sphi %s3407_s20, %s4615_s20   ;;  %s3353_s19 = sphi %s3405_s19, %s4614_s19   ;;  %s3349_s18 = sphi %s3403_s18, %s4613_s18  }
   0x7   : > { %p42_p0 = scmp.ne.s32.totalorder %s3353_s19, %s3349_s18  ;;  %p4597_p1 = scmp.eq.s32.totalorder %s3424_s22, 0 }
   0x8   : > { %p156_p3 = scmp.eq.s32.totalorder %s2516_s23, 1  ;;  %p2517_p5 = scmp.ge.s32.totalorder %s3361_s21, 1 }
   0x9   : > { %p3433_p4 = por %p4597_p1, %p42_p0  ;;  %p163_p7 = scmp.lt.s32.totalorder %s3361_s21, 3 }
   0xa   : > { %p3438_p6 = por %p156_p3, %p42_p0  ;;  %s3363_s27 = smov [#allocation5]  }
   0xb   : > { %s4600_s24 = scalar_select %p3433_p4, 1, 0 }
   0xc   : > { %s4601_s25 = scalar_select %p3438_p6, 1, 0 }
   0xd   : > { %p3443_p8 = pnand %p2517_p5, %p163_p7  ;;  %s175_s28 = sshll.u32 %s3363_s27, 4  ;;  %s3447_s28 = int_to_ptr.vmem [resolvable:$true] %s175_s28 }
   0xe   : > { %s3364_s30 = smov [#allocation7]   ;;  %s3205_s9 = scalar_lea.hbm %s4592_s1, 8192 }
   0xf   : > { %p2792_p9 = pneg %p3443_p8  ;;  %s191_s6 = sshll.u32 %s3364_s30, 4  ;;  %s3458_s6 = int_to_ptr.vmem [resolvable:$true] %s191_s6 }
  0x10   : > { %p3206_p12 = scmp.ne.s32.totalorder %s4592_s1, %s3205_s9  ;;  %p3212_p5 = scmp.lt.u32.totalorder %s3205_s9, %s4592_s1 }
  0x11   : > { %p3454_p11 = pnand %p2792_p9, %p4597_p1 }
  0x13   : > { %p3207_p13 = pneg %p3454_p11 }
  0x15   : > { %p3208_p0 = pnand %p3207_p13, %p3206_p12 }
  0x17   : > { %p3209_p3 = pneg %p3208_p0 }
  0x19   : > { %p3214_p7 = pnand %p3212_p5, %p3209_p3 }
  0x1b   : > { %3217 = shalt.err (!%p3214_p7)
}
  0x1c   : > { %s3218_s14 = scalar_lea.vmem %s3447_s28, 8192  ;;  %p3226_p2 = scmp.lt.s32.totalorder %s3447_s28, %s3447_s28 }
  0x1d   : > { %p3219_p9 = scmp.ne.s32.totalorder %s3447_s28, %s3218_s14  ;;  %p3227_p12 = scmp.lt.s32.totalorder %s3218_s14, %s3218_s14 }
  0x1f   : > { %p3221_p10 = pnand %p3219_p9, %p3207_p13  ;;  %p3228_p0 = por %p3227_p12, %p3226_p2 }
  0x21   : > { %p3222_p1 = pneg %p3221_p10 }
  0x23   : > { %p3229_p6 = pnand %p3228_p0, %p3222_p1 }
  0x25   : > { %3232 = shalt.err (!%p3229_p6)
}
  0x26   : > { %s3365_s15 = smov 256   ;;  %s3366_s16 = smov 16  }
  0x27   : > { %2795 = dma.hbm_to_vmem [thread:$0]  (!%p3454_p11), %s4592_s1, 8192, %s3447_s28, [#allocation6], %s3365_s15, %s3365_s15, %s3366_s16  }
  0x28   : > { %s3233_s7 = scalar_lea.hbm %s4594_s3, 8192 }
  0x29   : > { %p3234_p2 = scmp.ne.s32.totalorder %s4594_s3, %s3233_s7  ;;  %p3240_p10 = scmp.lt.u32.totalorder %s3233_s7, %s4594_s3 }
  0x2b   : > { %p3236_p1 = pnand %p3234_p2, %p3207_p13 }
  0x2d   : > { %p3237_p6 = pneg %p3236_p1 }
  0x2f   : > { %p3242_p3 = pnand %p3240_p10, %p3237_p6 }
  0x31   : > { %3245 = shalt.err (!%p3242_p3)
}
  0x32   : > { %s3246_s28 = scalar_lea.vmem %s3458_s6, 8192  ;;  %p3254_p12 = scmp.lt.s32.totalorder %s3458_s6, %s3458_s6 }
  0x33   : > { %p3247_p5 = scmp.ne.s32.totalorder %s3458_s6, %s3246_s28  ;;  %p3255_p0 = scmp.lt.s32.totalorder %s3246_s28, %s3246_s28 }
  0x35   : > { %p3249_p7 = pnand %p3247_p5, %p3207_p13  ;;  %p3256_p2 = por %p3255_p0, %p3254_p12 }
  0x37   : > { %p3250_p9 = pneg %p3249_p7 }
  0x39   : > { %p3257_p1 = pnand %p3256_p2, %p3250_p9 }
  0x3b   : > { %3260 = shalt.err (!%p3257_p1)
}
  0x3c   : > { %s3367_s12 = smov 128   ;;  %s3368_s13 = smov 8  }
  0x3d   : > { %2798 = dma.hbm_to_vmem [thread:$0]  (!%p3454_p11), %s4594_s3, 8192, %s3458_s6, [#allocation6], %s3367_s12, %s3367_s12, %s3368_s13  }
  0x3e   : > { %s3516_s16 = sadd.s32 1, %s3361_s21   ;;  %s29_s23 = sadd.s32 1, %s3357_s20 }
  0x3f   : > { %s26_s17 = ssub.s32 %s3361_s21, %s3516_s16  ;;  %p36_p6 = scmp.ne.s32.totalorder %s3357_s20, %s3353_s19 }
  0x40   : > { %p27_p13 = scmp.eq.s32.totalorder %s26_s17, 0  ;;  %p37_p10 = scmp.eq.s32.totalorder %s3361_s21, 0 }
  0x41   : > { %p4604_p5 = scmp.eq.s32.totalorder %s3424_s22, 1  ;;  %p2809_p9 = scmp.lt.s32.totalorder %s3361_s21, 2 }
  0x42   : > { %s3525_s27 = scalar_select %p27_p13, %s3357_s20, %s29_s23  }
  0x43   : > { %p38_p3 = por %p37_p10, %p36_p6  ;;  %p3529_p7 = por %p4604_p5, %p36_p6 }
  0x44   : > { %s208_s30 = sand.u32 1, %s3357_s20   ;;  %s2697_s6 = sshll.u32 %s3361_s21, 11 }
  0x45   : > { %s4605_s29 = scalar_select %p3529_p7, 1, 0 }
  0x46   : > { %s2521_s7 = sshll.u32 %s208_s30, 7  ;;  %s3539_s10 = scalar_lea.hbm %s4591_s0, %s2697_s6 }
  0x47   : > { %s212_s11 = scalar_lea.vmem [#allocation2], %s2521_s7  ;;  %p3543_p11 = pnand %p2809_p9, %p38_p3 }
  0x48   : > { %s220_s28 = sshll.u32 %s212_s11, 4  ;;  %s3547_s15 = scalar_lea.sflag [#allocation3], %s208_s30  ;;  %s3541_s28 = int_to_ptr.vmem [resolvable:$true] %s220_s28 }
  0x49   : > { %s3261_s17 = scalar_lea.hbm %s3539_s10, 2048  ;;  %p3263_p0 = pneg %p3543_p11 }
  0x4a   : > { %p3262_p12 = scmp.ne.s32.totalorder %s3539_s10, %s3261_s17  ;;  %s3266_s6 = scalar_lea.hbm %s4591_s0, 4096 }
  0x4b   : > { %p3267_p13 = scmp.lt.u32.totalorder %s3539_s10, %s4591_s0  ;;  %p3268_p6 = scmp.lt.u32.totalorder %s3266_s6, %s3261_s17 }
  0x4c   : > { %p3264_p2 = pnand %p3263_p0, %p3262_p12  ;;  %p3270_p3 = scmp.lt.u32.totalorder %s3261_s17, %s3539_s10 }
  0x4d   : > { %p3269_p10 = por %p3268_p6, %p3267_p13 }
  0x4e   : > { %p3265_p1 = pneg %p3264_p2 }
  0x4f   : > { %p3271_p5 = por %p3270_p3, %p3269_p10 }
  0x51   : > { %p3272_p9 = pnand %p3271_p5, %p3265_p1 }
  0x53   : > { %3275 = shalt.err (!%p3272_p9)
}
  0x54   : > { %s3276_s30 = scalar_lea.vmem %s3541_s28, 2048  ;;  %s3369_s11 = smov [#allocation2]  }
  0x55   : > { %p3277_p12 = scmp.ne.s32.totalorder %s3541_s28, %s3276_s30  ;;  %s3281_s23 = sshll.u32 %s3369_s11, 4  ;;  %s3282_s23 = int_to_ptr.vmem [resolvable:$false] %s3281_s23 }
  0x56   : > { %s3283_s7 = scalar_lea.vmem %s3282_s23, 4096  ;;  %p3284_p4 = scmp.lt.s32.totalorder %s3541_s28, %s3282_s23 }
  0x57   : > { %p3279_p2 = pnand %p3277_p12, %p3263_p0  ;;  %p3285_p13 = scmp.lt.s32.totalorder %s3283_s7, %s3276_s30 }
  0x59   : > { %p3280_p7 = pneg %p3279_p2  ;;  %p3286_p6 = por %p3285_p13, %p3284_p4 }
  0x5b   : > { %p3287_p10 = pnand %p3286_p6, %p3280_p7 }
  0x5d   : > { %3290 = shalt.err (!%p3287_p10)
}
  0x5e   : > { %2802 = dma.hbm_to_vmem [thread:$0]  (!%p3543_p11), %s3539_s10, 2048, %s3541_s28, %s3547_s15, %s3367_s12, %s3367_s12, %s3368_s13  }
  0x5f   : > { %232 = sbr.rel (%p3443_p8) target bundleno = 812 (0x32c), region = 40  ;;  %s3581_s17 = sand.u32 (!%p3443_p8), 1, %s3353_s19  }
  0x60   : > { %s2526_s6 = sshll.u32 (!%p3443_p8), %s3581_s17, 7  ;;  %s235_s8 = scalar_lea.sflag (!%p3443_p8), [#allocation3], %s3581_s17 }
  0x61   : > { %s3587_s14 = scalar_lea.vmem (!%p3443_p8), [#allocation2], %s2526_s6  ;;  %p4607_p4 = scmp.ne.s32.totalorder (!%p3443_p8), %s4600_s24, 0 }
  0x66   : > { %3336 = dma.done.wait (%p4607_p4), %s235_s8, 2048  }
  0x67   : > { %3338 = vsyncadd (%p4607_p4), %s235_s8, 4294965248  ;;  %p4608_p7 = scmp.eq.s32.totalorder %s3424_s22, 0 }
  0x69   : > { %3340 = dma.done.wait (%p4608_p7), [#allocation6], 16384   ;;  %p4609_p8 = pmov %p4608_p7 }
  0x6a   : > { %v2853_v0 = vld [vmem:[#allocation5 + $0x4] ss:$16 sps:$4 sm:$0xff]   ;;  %v2855_v1 = vld [vmem:[#allocation5] ss:$16 sps:$4 sm:$0xff]   ;;  %v276_v14 = vld [vmem:[%s3587_s14 + $0x8] sm:$0xff]  ;;  %s4480_s10 = scalar_lea.vmem [#allocation8], %s2526_s6 }
  0x6b   : > { %3342 = vsyncadd (%p4609_p8), [#allocation6], 4294950912  ;;  %777 = vmatprep.subr.bf16.mxu1 %v2853_v0  ;;  %v2856_v2 = vld [vmem:[#allocation5 + $0x24] ss:$16 sps:$4 sm:$0xff]   ;;  %v2858_v3 = vld [vmem:[#allocation5 + $0x20] ss:$16 sps:$4 sm:$0xff]  }
  0x6c   : > { %778 = vmatpush1.bf16.msra.mxu1 %v2855_v1  ;;  %v2859_v4 = vld [vmem:[#allocation5 + $0x44] ss:$16 sps:$4 sm:$0xff]   ;;  %v2861_v5 = vld [vmem:[#allocation5 + $0x40] ss:$16 sps:$4 sm:$0xff]   ;;  %v2905_v38 = vld [vmem:[#allocation5 + $0xc] ss:$16 sps:$4 sm:$0xff]  }
  0x6d   : > { %779 = vmatprep.subr.bf16.mxu1 %v2856_v2  ;;  %v2862_v6 = vld [vmem:[#allocation5 + $0x64] ss:$16 sps:$4 sm:$0xff]   ;;  %v2864_v7 = vld [vmem:[#allocation5 + $0x60] ss:$16 sps:$4 sm:$0xff]   ;;  %v278_v40 = vld [vmem:[%s3587_s14 + $0x18] sm:$0xff]  ;;  %s2715_s28 = sshll.u32 %s3424_s22, 11 }
  0x6e   : > { %v2865_v8 = vld [vmem:[#allocation5 + $0x84] ss:$16 sps:$4 sm:$0xff]   ;;  %v2867_v9 = vld [vmem:[#allocation5 + $0x80] ss:$16 sps:$4 sm:$0xff]   ;;  %v2903_v43 = vld [vmem:[#allocation5 + $0x8] ss:$16 sps:$4 sm:$0xff]   ;;  %s4543_s11 = scalar_lea.hbm %s4596_s5, %s2715_s28 }
  0x6f   : > { %v2868_v10 = vld [vmem:[#allocation5 + $0xa4] ss:$16 sps:$4 sm:$0xff]   ;;  %v2870_v11 = vld [vmem:[#allocation5 + $0xa0] ss:$16 sps:$4 sm:$0xff]   ;;  %v2908_v44 = vld [vmem:[#allocation5 + $0x2c] ss:$16 sps:$4 sm:$0xff]  }
  0x70   : > { %780 = vmatpush1.bf16.msra.mxu1 %v2858_v3  ;;  %v2871_v12 = vld [vmem:[#allocation5 + $0xc4] ss:$16 sps:$4 sm:$0xff]   ;;  %v2873_v16 = vld [vmem:[#allocation5 + $0xc0] ss:$16 sps:$4 sm:$0xff]   ;;  %v2906_v49 = vld [vmem:[#allocation5 + $0x28] ss:$16 sps:$4 sm:$0xff]  }
  0x71   : > { %781 = vmatprep.subr.bf16.mxu1 %v2859_v4  ;;  %v275_v13 = vld [vmem:[%s3587_s14] sm:$0xff]  ;;  %v2968_v36 = vld [vmem:[#allocation7 + $0x14] ss:$8 sps:$4 sm:$0xff]   ;;  %v2970_v41 = vld [vmem:[#allocation7 + $0x10] ss:$8 sps:$4 sm:$0xff]   ;;  %s2424_s15 = sshll.u32 %s4480_s10, 4  ;;  %s4545_s15 = int_to_ptr.vmem [resolvable:$true] %s2424_s15 }
  0x72   : > { %v3599_v15 = vcombine.high %v275_v13, %v276_v14  ;;  %v2874_v17 = vld [vmem:[#allocation5 + $0xe4] ss:$16 sps:$4 sm:$0xff]   ;;  %v2876_v18 = vld [vmem:[#allocation5 + $0xe0] ss:$16 sps:$4 sm:$0xff]   ;;  %v3604_v42 = vcombine.low %v275_v13, %v276_v14  ;;  %v2913_v50 = vld [vmem:[#allocation5 + $0x4c] ss:$16 sps:$4 sm:$0xff]  }
  0x73   : > { %v2877_v19 = vld [vmem:[#allocation5 + $0x104] ss:$16 sps:$4 sm:$0xff]   ;;  %v2879_v20 = vld [vmem:[#allocation5 + $0x100] ss:$16 sps:$4 sm:$0xff]   ;;  %v280_v52 = vld [vmem:[%s3587_s14 + $0x28] sm:$0xff]  ;;  %s2410_s23 = scalar_lea.sflag [#allocation4], %s3581_s17 }
  0x74   : > { %782 = vmatpush1.bf16.msra.mxu1 %v2861_v5  ;;  %809 = vmatprep.mubr.bf16.mxu1 %v3599_v15  ;;  %v2880_v21 = vld [vmem:[#allocation5 + $0x124] ss:$16 sps:$4 sm:$0xff]   ;;  %v2882_v22 = vld [vmem:[#allocation5 + $0x120] ss:$16 sps:$4 sm:$0xff]   ;;  %v2911_v55 = vld [vmem:[#allocation5 + $0x48] ss:$16 sps:$4 sm:$0xff]  }
  0x75   : > { %783 = vmatprep.subr.bf16.mxu1 %v2862_v6  ;;  %v2883_v23 = vld [vmem:[#allocation5 + $0x144] ss:$16 sps:$4 sm:$0xff]   ;;  %v2885_v24 = vld [vmem:[#allocation5 + $0x140] ss:$16 sps:$4 sm:$0xff]   ;;  %v2916_v57 = vld [vmem:[#allocation5 + $0x6c] ss:$16 sps:$4 sm:$0xff]  }
  0x76   : > { %v2886_v25 = vld [vmem:[#allocation5 + $0x164] ss:$16 sps:$4 sm:$0xff]   ;;  %v2888_v26 = vld [vmem:[#allocation5 + $0x160] ss:$16 sps:$4 sm:$0xff]   ;;  %v2914_v61 = vld [vmem:[#allocation5 + $0x68] ss:$16 sps:$4 sm:$0xff]  }
  0x77   : > { %v2889_v27 = vld [vmem:[#allocation5 + $0x184] ss:$16 sps:$4 sm:$0xff]   ;;  %v2891_v28 = vld [vmem:[#allocation5 + $0x180] ss:$16 sps:$4 sm:$0xff]   ;;  %v2921_v62 = vld [vmem:[#allocation5 + $0x8c] ss:$16 sps:$4 sm:$0xff]  }
  0x78   : > { %784 = vmatpush1.bf16.msra.mxu1 %v2864_v7  ;;  %v2892_v29 = vld [vmem:[#allocation5 + $0x1a4] ss:$16 sps:$4 sm:$0xff]   ;;  %v2894_v30 = vld [vmem:[#allocation5 + $0x1a0] ss:$16 sps:$4 sm:$0xff]   ;;  %v282_v0 = vld [vmem:[%s3587_s14 + $0x38] sm:$0xff]  ;;  %s3291_s7 = scalar_lea.vmem %s4545_s15, 2048 }
  0x79   : > { %785 = vmatprep.subr.bf16.mxu1 %v2865_v8  ;;  %v2895_v31 = vld [vmem:[#allocation5 + $0x1c4] ss:$16 sps:$4 sm:$0xff]   ;;  %v2897_v32 = vld [vmem:[#allocation5 + $0x1c0] ss:$16 sps:$4 sm:$0xff]   ;;  %v2919_v4 = vld [vmem:[#allocation5 + $0x88] ss:$16 sps:$4 sm:$0xff]   ;;  %p3292_p11 = scmp.ne.s32.totalorder %s4545_s15, %s3291_s7 }
  0x7a   : > { %v2898_v33 = vld [vmem:[#allocation5 + $0x1e4] ss:$16 sps:$4 sm:$0xff]   ;;  %v2967_v35 = vld [vmem:[#allocation7] ss:$8 sps:$4 sm:$0xff]   ;;  %v2976_v53 = vld [vmem:[#allocation7 + $0x30] ss:$8 sps:$4 sm:$0xff]  }
  0x7b   : > { %v2965_v34 = vld [vmem:[#allocation7 + $0x4] ss:$8 sps:$4 sm:$0xff]   ;;  %v2900_v37 = vld [vmem:[#allocation5 + $0x1e0] ss:$16 sps:$4 sm:$0xff]   ;;  %v2974_v48 = vld [vmem:[#allocation7 + $0x34] ss:$8 sps:$4 sm:$0xff]  }
  0x7c   : > { %786 = vmatpush1.bf16.msra.mxu1 %v2867_v9  ;;  %v277_v39 = vld [vmem:[%s3587_s14 + $0x10] sm:$0xff]  ;;  %2007 = vmatprep.subr.bf16.mxu0 %v2965_v34  ;;  %v2971_v45 = vld [vmem:[#allocation7 + $0x24] ss:$8 sps:$4 sm:$0xff]   ;;  %v2973_v47 = vld [vmem:[#allocation7 + $0x20] ss:$8 sps:$4 sm:$0xff]   ;;  %p4610_p0 = scmp.ne.s32.totalorder %s4605_s29, 0 }
  0x7d   : > { %787 = vmatprep.subr.bf16.mxu1 %v2868_v10  ;;  %2008 = vmatpush1.bf16.msra.mxu0 %v2967_v35  ;;  %v3606_v46 = vcombine.high %v277_v39, %v278_v40  ;;  %v279_v51 = vld [vmem:[%s3587_s14 + $0x20] sm:$0xff]  ;;  %v3612_v56 = vcombine.low %v277_v39, %v278_v40  ;;  %v2980_v60 = vld [vmem:[#allocation7 + $0x54] ss:$8 sps:$4 sm:$0xff]   ;;  %v2982_v1 = vld [vmem:[#allocation7 + $0x50] ss:$8 sps:$4 sm:$0xff]   ;;  %s3370_s22 = smov [#allocation8]  }
  0x7e   : > { %2009 = vmatprep.subr.bf16.mxu0 %v2968_v36  ;;  %v2977_v54 = vld [vmem:[#allocation7 + $0x44] ss:$8 sps:$4 sm:$0xff]   ;;  %v3614_v58 = vcombine.high %v279_v51, %v280_v52  ;;  %v2979_v59 = vld [vmem:[#allocation7 + $0x40] ss:$8 sps:$4 sm:$0xff]   ;;  %v281_v63 = vld [vmem:[%s3587_s14 + $0x30] sm:$0xff]  ;;  %v3620_v2 = vcombine.low %v279_v51, %v280_v52  ;;  %p3293_p1 = pnand %p3292_p11, %p4610_p0  ;;  %s3295_s6 = sshll.u32 %s3370_s22, 4  ;;  %s3296_s6 = int_to_ptr.vmem [resolvable:$false] %s3295_s6 }
  0x7f   : > { %v2983_v3 = vld [vmem:[#allocation7 + $0x64] ss:$8 sps:$4 sm:$0xff]   ;;  %v3622_v5 = vcombine.high %v281_v63, %v282_v0  ;;  %v2985_v7 = vld [vmem:[#allocation7 + $0x60] ss:$8 sps:$4 sm:$0xff]   ;;  %v289_v35 = vld [vmem:[%s3587_s14 + $0x70] sm:$0xff]  ;;  %s3297_s8 = scalar_lea.vmem %s3296_s6, 4096  ;;  %p3298_p5 = scmp.lt.s32.totalorder %s4545_s15, %s3296_s6 }
  0x80   : > { %788 = vmatpush1.bf16.msra.mxu1 %v2870_v11  ;;  %v2924_v6 = vld [vmem:[#allocation5 + $0xac] ss:$16 sps:$4 sm:$0xff]   ;;  %v2922_v8 = vld [vmem:[#allocation5 + $0xa8] ss:$16 sps:$4 sm:$0xff]   ;;  %v283_v10 = vld [vmem:[%s3587_s14 + $0x40] sm:$0xff]  ;;  %p3294_p3 = pneg %p3293_p1  ;;  %p3299_p9 = scmp.lt.s32.totalorder %s3297_s8, %s3291_s7 }
  0x81   : > { %789 = vmatprep.subr.bf16.mxu1 %v2871_v12  ;;  %2010 = vmatpush1.bf16.msra.mxu0 %v2970_v41  ;;  %v2929_v9 = vld [vmem:[#allocation5 + $0xcc] ss:$16 sps:$4 sm:$0xff]   ;;  %v3628_v12 = vcombine.low %v281_v63, %v282_v0  ;;  %v2927_v13 = vld [vmem:[#allocation5 + $0xc8] ss:$16 sps:$4 sm:$0xff]  }
  0x82   : > { %2011 = vmatprep.subr.bf16.mxu0 %v2971_v45  ;;  %v284_v11 = vld [vmem:[%s3587_s14 + $0x48] sm:$0xff]  ;;  %v290_v36 = vld [vmem:[%s3587_s14 + $0x78] sm:$0xff]  ;;  %p3300_p12 = por %p3299_p9, %p3298_p5 }
  0x83   : > { %v3630_v14 = vcombine.high %v283_v10, %v284_v11  ;;  %v2953_v34 = vld [vmem:[#allocation5 + $0x18c] ss:$16 sps:$4 sm:$0xff]   ;;  %v3654_v39 = vcombine.high %v289_v35, %v290_v36  ;;  %v2954_v41 = vld [vmem:[#allocation5 + $0x1a8] ss:$16 sps:$4 sm:$0xff]  }
  0x84   : > { %790 = vmatpush1.bf16.msra.mxu1 %v2873_v16  ;;  %v2932_v16 = vld [vmem:[#allocation5 + $0xec] ss:$16 sps:$4 sm:$0xff]   ;;  %v2959_v45 = vld [vmem:[#allocation5 + $0x1c8] ss:$16 sps:$4 sm:$0xff]   ;;  %p3301_p2 = pnand %p3300_p12, %p3294_p3 }
  0x85   : > { %791 = vmatprep.subr.bf16.mxu1 %v2874_v17  ;;  %2012 = vmatpush1.bf16.msra.mxu0 %v2973_v47  ;;  %v2930_v17 = vld [vmem:[#allocation5 + $0xe8] ss:$16 sps:$4 sm:$0xff]   ;;  %v2956_v40 = vld [vmem:[#allocation5 + $0x1ac] ss:$16 sps:$4 sm:$0xff]  }
  0x86   : > { %2013 = vmatprep.subr.bf16.mxu0 %v2974_v48  ;;  %v2964_v47 = vld [vmem:[#allocation5 + $0x1ec] ss:$16 sps:$4 sm:$0xff]   ;;  %v2962_v48 = vld [vmem:[#allocation5 + $0x1e8] ss:$16 sps:$4 sm:$0xff]  }
  0x87   : > { %v2989_v51 = vld [vmem:[#allocation7 + $0x84] ss:$8 sps:$4 sm:$0xff]   ;;  %v3012_v63 = vld [vmem:[#allocation7 + $0xf0] ss:$8 sps:$4 sm:$0xff]  }
  0x88   : > { %792 = vmatpush1.bf16.msra.mxu1 %v2876_v18  ;;  %v2937_v18 = vld [vmem:[#allocation5 + $0x10c] ss:$16 sps:$4 sm:$0xff]  }
  0x89   : > { %793 = vmatprep.subr.bf16.mxu1 %v2877_v19  ;;  %2014 = vmatpush1.bf16.msra.mxu0 %v2976_v53  ;;  %v285_v19 = vld [vmem:[%s3587_s14 + $0x50] sm:$0xff]  ;;  %v2995_v52 = vld [vmem:[#allocation7 + $0xa4] ss:$8 sps:$4 sm:$0xff]   ;;  %v2997_v53 = vld [vmem:[#allocation7 + $0xa0] ss:$8 sps:$4 sm:$0xff]  }
  0x8a   : > { %2015 = vmatprep.subr.bf16.mxu0 %v2977_v54  ;;  %v2998_v54 = vld [vmem:[#allocation7 + $0xb4] ss:$8 sps:$4 sm:$0xff]   ;;  %v3015_v0 = vld [vmem:[#allocation7 + $0x104] ss:$8 sps:$4 sm:$0xff]  }
  0x8c   : > { %794 = vmatpush1.bf16.msra.mxu1 %v2879_v20  ;;  %v286_v20 = vld [vmem:[%s3587_s14 + $0x58] sm:$0xff] }
  0x8d   : > { %795 = vmatprep.subr.bf16.mxu1 %v2880_v21  ;;  %2016 = vmatpush1.bf16.msra.mxu0 %v2979_v59  ;;  %v3636_v21 = vcombine.low %v283_v10, %v284_v11  ;;  %v3006_v59 = vld [vmem:[#allocation7 + $0xd0] ss:$8 sps:$4 sm:$0xff]  }
  0x8e   : > { %2017 = vmatprep.subr.bf16.mxu0 %v2980_v60  ;;  %v3007_v60 = vld [vmem:[#allocation7 + $0xe4] ss:$8 sps:$4 sm:$0xff]  }
  0x90   : > { %796 = vmatpush1.bf16.msra.mxu1 %v2882_v22  ;;  %v2935_v22 = vld [vmem:[#allocation5 + $0x108] ss:$16 sps:$4 sm:$0xff]  }
  0x91   : > { %797 = vmatprep.subr.bf16.mxu1 %v2883_v23  ;;  %2018 = vmatpush1.bf16.msra.mxu0 %v2982_v1  ;;  %v3638_v23 = vcombine.high %v285_v19, %v286_v20  ;;  %v357_v1 = vlaneseq }
  0x92   : > { %2019 = vmatprep.subr.bf16.mxu0 %v2983_v3 }
  0x94   : > { %798 = vmatpush1.bf16.msra.mxu1 %v2885_v24  ;;  %v2940_v24 = vld [vmem:[#allocation5 + $0x12c] ss:$16 sps:$4 sm:$0xff]  }
  0x95   : > { %799 = vmatprep.subr.bf16.mxu1 %v2886_v25  ;;  %2020 = vmatpush1.bf16.msra.mxu0 %v2985_v7  ;;  %v2938_v25 = vld [vmem:[#allocation5 + $0x128] ss:$16 sps:$4 sm:$0xff]  }
  0x98   : > { %800 = vmatpush1.bf16.msra.mxu1 %v2888_v26  ;;  %v2945_v26 = vld [vmem:[#allocation5 + $0x14c] ss:$16 sps:$4 sm:$0xff]  }
  0x99   : > { %801 = vmatprep.subr.bf16.mxu1 %v2889_v27  ;;  %v287_v27 = vld [vmem:[%s3587_s14 + $0x60] sm:$0xff] }
  0x9c   : > { %802 = vmatpush1.bf16.msra.mxu1 %v2891_v28  ;;  %v288_v28 = vld [vmem:[%s3587_s14 + $0x68] sm:$0xff] }
  0x9d   : > { %803 = vmatprep.subr.bf16.mxu1 %v2892_v29  ;;  %v3644_v29 = vcombine.low %v285_v19, %v286_v20 }
  0xa0   : > { %804 = vmatpush1.bf16.msra.mxu1 %v2894_v30  ;;  %v2943_v30 = vld [vmem:[#allocation5 + $0x148] ss:$16 sps:$4 sm:$0xff]  }
  0xa1   : > { %805 = vmatprep.subr.bf16.mxu1 %v2895_v31  ;;  %v3646_v31 = vcombine.high %v287_v27, %v288_v28 }
  0xa4   : > { %806 = vmatpush1.bf16.msra.mxu1 %v2897_v32  ;;  %v2948_v32 = vld [vmem:[#allocation5 + $0x16c] ss:$16 sps:$4 sm:$0xff]  }
  0xa5   : > { %807 = vmatprep.subr.bf16.mxu1 %v2898_v33  ;;  %v2946_v33 = vld [vmem:[#allocation5 + $0x168] ss:$16 sps:$4 sm:$0xff]  }
  0xa8   : > { %808 = vmatpush1.bf16.msra.mxu1 %v2900_v37  ;;  %v3652_v37 = vcombine.low %v287_v27, %v288_v28 }
  0xa9   : > { %890 = vmatprep.subr.bf16.mxu1 %v2905_v38  ;;  %v2951_v38 = vld [vmem:[#allocation5 + $0x188] ss:$16 sps:$4 sm:$0xff]  }
  0xab   : > { %810 = vmatmul.mubr.bf16.vlgmr.msra.gmra.mrb[0].mxu1 %v3604_v42 }
  0xac   : > { %891 = vmatpush1.bf16.msra.mxu1 %v2903_v43  ;;  %819 = vmatprep.mubr.bf16.mxu1 %v3606_v46  ;;  %v2961_v43 = vld [vmem:[#allocation5 + $0x1cc] ss:$16 sps:$4 sm:$0xff]  }
  0xad   : > { %892 = vmatprep.subr.bf16.mxu1 %v2908_v44  ;;  %v2544_v44 = vcombine.low %v289_v35, %v290_v36 }
  0xb0   : > { %893 = vmatpush1.bf16.msra.mxu1 %v2906_v49  ;;  %v2986_v49 = vld [vmem:[#allocation7 + $0x74] ss:$8 sps:$4 sm:$0xff]  }
  0xb1   : > { %894 = vmatprep.subr.bf16.mxu1 %v2913_v50  ;;  %v2988_v50 = vld [vmem:[#allocation7 + $0x70] ss:$8 sps:$4 sm:$0xff]   ;;  %2021 = vmatprep.subr.bf16.mxu0 %v2986_v49 }
  0xb2   : > { %2022 = vmatpush1.bf16.msra.mxu0 %v2988_v50 }
  0xb3   : > { %820 = vmatmul.mubr.bf16.gmra.mrb[4].mxu1 %v3612_v56  ;;  %2023 = vmatprep.subr.bf16.mxu0 %v2989_v51 }
  0xb4   : > { %895 = vmatpush1.bf16.msra.mxu1 %v2911_v55  ;;  %829 = vmatprep.mubr.bf16.mxu1 %v3614_v58  ;;  %v3000_v55 = vld [vmem:[#allocation7 + $0xb0] ss:$8 sps:$4 sm:$0xff]  }
  0xb5   : > { %896 = vmatprep.subr.bf16.mxu1 %v2916_v57  ;;  %v3003_v57 = vld [vmem:[#allocation7 + $0xc0] ss:$8 sps:$4 sm:$0xff]  }
  0xb8   : > { %897 = vmatpush1.bf16.msra.mxu1 %v2914_v61  ;;  %v3009_v61 = vld [vmem:[#allocation7 + $0xe0] ss:$8 sps:$4 sm:$0xff]  }
  0xb9   : > { %898 = vmatprep.subr.bf16.mxu1 %v2921_v62  ;;  %v3010_v62 = vld [vmem:[#allocation7 + $0xf4] ss:$8 sps:$4 sm:$0xff]  }
  0xbb   : > { %830 = vmatmul.mubr.bf16.gmra.mrb[8].mxu1 %v3620_v2 }
  0xbc   : > { %899 = vmatpush1.bf16.msra.mxu1 %v2919_v4  ;;  %839 = vmatprep.mubr.bf16.mxu1 %v3622_v5  ;;  %v3679_v4 = vld [vmem:[%s4593_s2] sm:$0xf] }
  0xbd   : > { %900 = vmatprep.subr.bf16.mxu1 %v2924_v6 }
  0xc0   : > { %901 = vmatpush1.bf16.msra.mxu1 %v2922_v8 }
  0xc1   : > { %902 = vmatprep.subr.bf16.mxu1 %v2929_v9 }
  0xc3   : > { %840 = vmatmul.mubr.bf16.gmra.mrb[12].mxu1 %v3628_v12 }
  0xc4   : > { %903 = vmatpush1.bf16.msra.mxu1 %v2927_v13  ;;  %849 = vmatprep.mubr.bf16.mxu1 %v3630_v14 }
  0xc5   : > { %904 = vmatprep.subr.bf16.mxu1 %v2932_v16 }
  0xc8   : > { %905 = vmatpush1.bf16.msra.mxu1 %v2930_v17 }
  0xc9   : > { %906 = vmatprep.subr.bf16.mxu1 %v2937_v18 }
  0xcb   : > { %850 = vmatmul.mubr.bf16.gmra.mrb[16].mxu1 %v3636_v21 }
  0xcc   : > { %907 = vmatpush1.bf16.msra.mxu1 %v2935_v22  ;;  %859 = vmatprep.mubr.bf16.mxu1 %v3638_v23 }
  0xcd   : > { %908 = vmatprep.subr.bf16.mxu1 %v2940_v24 }
  0xd0   : > { %909 = vmatpush1.bf16.msra.mxu1 %v2938_v25 }
  0xd1   : > { %910 = vmatprep.subr.bf16.mxu1 %v2945_v26 }
  0xd3   : > { %860 = vmatmul.mubr.bf16.gmra.mrb[20].mxu1 %v3644_v29 }
  0xd4   : > { %911 = vmatpush1.bf16.msra.mxu1 %v2943_v30  ;;  %869 = vmatprep.mubr.bf16.mxu1 %v3646_v31 }
  0xd5   : > { %912 = vmatprep.subr.bf16.mxu1 %v2948_v32 }
  0xd8   : > { %913 = vmatpush1.bf16.msra.mxu1 %v2946_v33 }
  0xd9   : > { %914 = vmatprep.subr.bf16.mxu1 %v2953_v34 }
  0xdb   : > { %870 = vmatmul.mubr.bf16.gmra.mrb[24].mxu1 %v3652_v37 }
  0xdc   : > { %915 = vmatpush1.bf16.msra.mxu1 %v2951_v38  ;;  %879 = vmatprep.mubr.bf16.mxu1 %v3654_v39 }
  0xdd   : > { %916 = vmatprep.subr.bf16.mxu1 %v2956_v40 }
  0xe0   : > { %917 = vmatpush1.bf16.msra.mxu1 %v2954_v41 }
  0xe1   : > { %918 = vmatprep.subr.bf16.mxu1 %v2961_v43 }
  0xe3   : > { %880 = vmatmul.mubr.bf16.gmra.mrb[28].mxu1 %v2544_v44 }
  0xe4   : > { %919 = vmatpush1.bf16.msra.mxu1 %v2959_v45  ;;  %922 = vmatprep.mubr.bf16.mxu1 %v3599_v15  ;;  %v2991_v15 = vld [vmem:[#allocation7 + $0x80] ss:$8 sps:$4 sm:$0xff]  }
  0xe5   : > { %920 = vmatprep.subr.bf16.mxu1 %v2964_v47  ;;  %2024 = vmatpush1.bf16.msra.mxu0 %v2991_v15 }
  0xe8   : > { %921 = vmatpush1.bf16.msra.mxu1 %v2962_v48 }
  0xeb   : > { %923 = vmatmul.mubr.bf16.vlgmr.msra.gmra.mrb[32].mxu1 %v3604_v42  ;;  %v2992_v42 = vld [vmem:[#allocation7 + $0x94] ss:$8 sps:$4 sm:$0xff]  }
  0xec   : > { %932 = vmatprep.mubr.bf16.mxu1 %v3606_v46  ;;  %v2994_v46 = vld [vmem:[#allocation7 + $0x90] ss:$8 sps:$4 sm:$0xff]   ;;  %2025 = vmatprep.subr.bf16.mxu0 %v2992_v42 }
  0xed   : > { %2026 = vmatpush1.bf16.msra.mxu0 %v2994_v46 }
  0xee   : > { %2027 = vmatprep.subr.bf16.mxu0 %v2995_v52 }
  0xf1   : > { %2028 = vmatpush1.bf16.msra.mxu0 %v2997_v53 }
  0xf2   : > { %2029 = vmatprep.subr.bf16.mxu0 %v2998_v54 }
  0xf3   : > { %933 = vmatmul.mubr.bf16.gmra.mrb[36].mxu1 %v3612_v56  ;;  %v3001_v56 = vld [vmem:[#allocation7 + $0xc4] ss:$8 sps:$4 sm:$0xff]  }
  0xf4   : > { %942 = vmatprep.mubr.bf16.mxu1 %v3614_v58  ;;  %v3004_v58 = vld [vmem:[#allocation7 + $0xd4] ss:$8 sps:$4 sm:$0xff]  }
  0xf5   : > { %2030 = vmatpush1.bf16.msra.mxu0 %v3000_v55 }
  0xf6   : > { %2031 = vmatprep.subr.bf16.mxu0 %v3001_v56 }
  0xf9   : > { %2032 = vmatpush1.bf16.msra.mxu0 %v3003_v57 }
  0xfa   : > { %2033 = vmatprep.subr.bf16.mxu0 %v3004_v58 }
  0xfb   : > { %943 = vmatmul.mubr.bf16.gmra.mrb[40].mxu1 %v3620_v2  ;;  %v3673_v2 = vshrl.u32 %v357_v1, 7 }
  0xfc   : > { %952 = vmatprep.mubr.bf16.mxu1 %v3622_v5 }
  0xfd   : > { %2034 = vmatpush1.bf16.msra.mxu0 %v3006_v59  ;;  %v359_v3 = vsub.s32 0, %v3673_v2  ;;  %v363_v5 = vsub.s32 1, %v3673_v2  ;;  %v367_v36 = vsub.s32 2, %v3673_v2 }
  0xfe   : > { %2035 = vmatprep.subr.bf16.mxu0 %v3007_v60 }
  0xff   : > { %v3685_v6 = vrot.slane %v3679_v4, %v359_v3  ;;  %v3690_v7 = vrot.slane %v3679_v4, %v363_v5  ;;  %v3746_v56 = vrot.slane %v3679_v4, %v367_v36 }
 0x101   : > { %2036 = vmatpush1.bf16.msra.mxu0 %v3009_v61  ;;  %v371_v61 = vsub.s32 3, %v3673_v2 }
 0x102   : > { %2037 = vmatprep.subr.bf16.mxu0 %v3010_v62 }
 0x103   : > { %953 = vmatmul.mubr.bf16.gmra.mrb[44].mxu1 %v3628_v12 }
 0x104   : > { %962 = vmatprep.mubr.bf16.mxu1 %v3630_v14 }
 0x105   : > { %2038 = vmatpush1.bf16.msra.mxu0 %v3012_v63 }
 0x106   : > { %2120 = vmatprep.subr.bf16.mxu0 %v3015_v0 }
 0x10b   : > { %963 = vmatmul.mubr.bf16.gmra.mrb[48].mxu1 %v3636_v21 }
 0x10c   : > { %972 = vmatprep.mubr.bf16.mxu1 %v3638_v23 }
 0x113   : > { %973 = vmatmul.mubr.bf16.gmra.mrb[52].mxu1 %v3644_v29 }
 0x114   : > { %982 = vmatprep.mubr.bf16.mxu1 %v3646_v31 }
 0x11b   : > { %983 = vmatmul.mubr.bf16.gmra.mrb[56].mxu1 %v3652_v37 }
 0x11c   : > { %992 = vmatprep.mubr.bf16.mxu1 %v3654_v39 }
 0x123   : > { %993 = vmatmul.mubr.bf16.gmra.mrb[60].mxu1 %v2544_v44 }
 0x17e   : > { %v811_v8 = vpop.f32.mrb[0].mxu1 }
 0x17f   : > { %v3693_v9 = vadd.f32 %v811_v8, %v3685_v6  ;;  %v813_v10 = vpop.f32.mrb[1].mxu1 }
 0x180   : > { %v3696_v11 = vadd.f32 %v813_v10, %v3690_v7  ;;  %v815_v12 = vpop.f32.mrb[2].mxu1 }
 0x181   : > { %v1003_v13 = vmul.f32 %v3693_v9, %v3693_v9  ;;  %v3701_v14 = vadd.f32 %v815_v12, %v3685_v6  ;;  %v817_v16 = vpop.f32.mrb[3].mxu1 }
 0x182   : > { %v1004_v17 = vmul.f32 %v3696_v11, %v3696_v11  ;;  %v3706_v18 = vadd.f32 %v817_v16, %v3690_v7 }
 0x183   : > { %v1067_v19 = vmul.f32 %v1003_v13, %v3693_v9  ;;  %v1007_v20 = vmul.f32 %v3701_v14, %v3701_v14 }
 0x184   : > { %v1068_v21 = vmul.f32 %v1004_v17, %v3696_v11  ;;  %v1008_v22 = vmul.f32 %v3706_v18, %v3706_v18 }
 0x185   : > { %v1131_v23 = vmul.f32 0.044715, %v1067_v19  ;;  %v1071_v24 = vmul.f32 %v1007_v20, %v3701_v14 }
 0x186   : > { %v1132_v25 = vmul.f32 0.044715, %v1068_v21  ;;  %v1072_v26 = vmul.f32 %v1008_v22, %v3706_v18  ;;  %v821_v27 = vpop.f32.mrb[4].mxu1 }
 0x187   : > { %v1195_v28 = vadd.f32 %v1131_v23, %v3693_v9  ;;  %v1135_v29 = vmul.f32 0.044715, %v1071_v24  ;;  %v3718_v30 = vadd.f32 %v821_v27, %v3685_v6  ;;  %v823_v31 = vpop.f32.mrb[5].mxu1 }
 0x188   : > { %v1136_v32 = vmul.f32 0.044715, %v1072_v26  ;;  %v3721_v33 = vadd.f32 %v823_v31, %v3690_v7  ;;  %v825_v34 = vpop.f32.mrb[6].mxu1  ;;  %v1196_v35 = vadd.f32 %v1132_v25, %v3696_v11 }
 0x189   : > { %v1259_v37 = vmul.f32 0.7978846, %v1195_v28  ;;  %v1199_v38 = vadd.f32 %v1135_v29, %v3701_v14  ;;  %v1011_v39 = vmul.f32 %v3718_v30, %v3718_v30  ;;  %v3729_v40 = vadd.f32 %v825_v34, %v3685_v6  ;;  %v827_v41 = vpop.f32.mrb[7].mxu1 }
 0x18a   : > { %v1012_v43 = vmul.f32 %v3721_v33, %v3721_v33  ;;  %v3734_v44 = vadd.f32 %v827_v41, %v3690_v7  ;;  %v1200_v45 = vadd.f32 %v1136_v32, %v3706_v18  ;;  %v1260_v47 = vmul.f32 0.7978846, %v1196_v35 }
 0x18b   : > { %3061 = vtanh.f32 %v1259_v37  ;;  %v1263_v48 = vmul.f32 0.7978846, %v1199_v38  ;;  %v1075_v49 = vmul.f32 %v1011_v39, %v3718_v30  ;;  %v1015_v50 = vmul.f32 %v3729_v40, %v3729_v40 }
 0x18c   : > { %v1076_v51 = vmul.f32 %v1012_v43, %v3721_v33  ;;  %v1016_v15 = vmul.f32 %v3734_v44, %v3734_v44  ;;  %v1264_v42 = vmul.f32 0.7978846, %v1200_v45  ;;  %3063 = vtanh.f32 %v1260_v47 }
 0x18d   : > { %3065 = vtanh.f32 %v1263_v48  ;;  %v1139_v46 = vmul.f32 0.044715, %v1075_v49  ;;  %v1079_v52 = vmul.f32 %v1015_v50, %v3729_v40  ;;  %v3777_v32 = vrot.slane %v3679_v4, %v371_v61 }
 0x18e   : > { %v1140_v53 = vmul.f32 0.044715, %v1076_v51  ;;  %v1080_v54 = vmul.f32 %v1016_v15, %v3734_v44  ;;  %v831_v55 = vpop.f32.mrb[8].mxu1  ;;  %3067 = vtanh.f32 %v1264_v42 }
 0x18f   : > { %v1203_v57 = vadd.f32 %v1139_v46, %v3718_v30  ;;  %v1143_v58 = vmul.f32 0.044715, %v1079_v52  ;;  %v3750_v59 = vadd.f32 %v831_v55, %v3685_v6  ;;  %v833_v60 = vpop.f32.mrb[9].mxu1 }
 0x190   : > { %v1204_v62 = vadd.f32 %v1140_v53, %v3721_v33  ;;  %v1144_v63 = vmul.f32 0.044715, %v1080_v54  ;;  %v3755_v0 = vadd.f32 %v833_v60, %v3690_v7  ;;  %v835_v1 = vpop.f32.mrb[10].mxu1 }
 0x191   : > { %v1267_v8 = vmul.f32 0.7978846, %v1203_v57  ;;  %v1207_v10 = vadd.f32 %v1143_v58, %v3729_v40  ;;  %v1019_v12 = vmul.f32 %v3750_v59, %v3750_v59  ;;  %v3761_v13 = vadd.f32 %v835_v1, %v3685_v6  ;;  %v837_v16 = vpop.f32.mrb[11].mxu1 }
 0x192   : > { %v1268_v17 = vmul.f32 0.7978846, %v1204_v62  ;;  %v1208_v19 = vadd.f32 %v1144_v63, %v3734_v44  ;;  %v1020_v20 = vmul.f32 %v3755_v0, %v3755_v0  ;;  %v3767_v21 = vadd.f32 %v837_v16, %v3690_v7 }
 0x193   : > { %3069 = vtanh.f32 %v1267_v8  ;;  %v1271_v22 = vmul.f32 0.7978846, %v1207_v10  ;;  %v1083_v23 = vmul.f32 %v1019_v12, %v3750_v59  ;;  %v1023_v24 = vmul.f32 %v3761_v13, %v3761_v13 }
 0x194   : > { %3071 = vtanh.f32 %v1268_v17  ;;  %v1272_v25 = vmul.f32 0.7978846, %v1208_v19  ;;  %v1084_v26 = vmul.f32 %v1020_v20, %v3755_v0  ;;  %v1024_v27 = vmul.f32 %v3767_v21, %v3767_v21 }
 0x195   : > { %v3062_v28 = vpop.eup %3061  ;;  %3073 = vtanh.f32 %v1271_v22  ;;  %v1147_v29 = vmul.f32 0.044715, %v1083_v23  ;;  %v1087_v31 = vmul.f32 %v1023_v24, %v3761_v13 }
 0x196   : > { %v3064_v34 = vpop.eup %3063  ;;  %3075 = vtanh.f32 %v1272_v25  ;;  %v1148_v35 = vmul.f32 0.044715, %v1084_v26  ;;  %v1088_v36 = vmul.f32 %v1024_v27, %v3767_v21  ;;  %v841_v37 = vpop.f32.mrb[12].mxu1  ;;  %v3780_v38 = vadd.f32 1.0, %v3062_v28 }
 0x197   : > { %v3066_v39 = vpop.eup %3065  ;;  %v1211_v41 = vadd.f32 %v1147_v29, %v3750_v59  ;;  %v1151_v43 = vmul.f32 0.044715, %v1087_v31  ;;  %v3784_v45 = vadd.f32 %v841_v37, %v3685_v6  ;;  %v843_v47 = vpop.f32.mrb[13].mxu1  ;;  %v1388_v48 = vadd.f32 1.0, %v3064_v34 }
 0x198   : > { %v1212_v4 = vadd.f32 %v1148_v35, %v3755_v0  ;;  %v1152_v49 = vmul.f32 0.044715, %v1088_v36  ;;  %v3788_v50 = vadd.f32 %v843_v47, %v3690_v7  ;;  %v845_v51 = vpop.f32.mrb[14].mxu1  ;;  %v3790_v15 = vadd.f32 1.0, %v3066_v39  ;;  %v3068_v55 = vpop.eup %3067 }
 0x199   : > { %v1275_v42 = vmul.f32 0.7978846, %v1211_v41  ;;  %v1215_v46 = vadd.f32 %v1151_v43, %v3761_v13  ;;  %v1027_v52 = vmul.f32 %v3784_v45, %v3784_v45  ;;  %v3796_v53 = vadd.f32 %v845_v51, %v3685_v6  ;;  %v847_v54 = vpop.f32.mrb[15].mxu1 }
 0x19a   : > { %v1276_v57 = vmul.f32 0.7978846, %v1212_v4  ;;  %v1216_v58 = vadd.f32 %v1152_v49, %v3767_v21  ;;  %v1028_v60 = vmul.f32 %v3788_v50, %v3788_v50  ;;  %v3802_v61 = vadd.f32 %v847_v54, %v3690_v7 }
 0x19b   : > { %3077 = vtanh.f32 %v1275_v42  ;;  %v1279_v62 = vmul.f32 0.7978846, %v1215_v46  ;;  %v1091_v63 = vmul.f32 %v1027_v52, %v3784_v45  ;;  %v1031_v1 = vmul.f32 %v3796_v53, %v3796_v53 }
 0x19c   : > { %3079 = vtanh.f32 %v1276_v57  ;;  %v1280_v8 = vmul.f32 0.7978846, %v1216_v58  ;;  %v1092_v10 = vmul.f32 %v1028_v60, %v3788_v50  ;;  %v1032_v12 = vmul.f32 %v3802_v61, %v3802_v61 }
 0x19d   : > { %v3810_v16 = vpop.eup %3069  ;;  %3081 = vtanh.f32 %v1279_v62  ;;  %v1155_v17 = vmul.f32 0.044715, %v1091_v63  ;;  %v1095_v19 = vmul.f32 %v1031_v1, %v3796_v53  ;;  %v1392_v20 = vadd.f32 1.0, %v3068_v55 }
 0x19e   : > { %v3813_v22 = vpop.eup %3071  ;;  %3083 = vtanh.f32 %v1280_v8  ;;  %v1156_v23 = vmul.f32 0.044715, %v1092_v10  ;;  %v1096_v24 = vmul.f32 %v1032_v12, %v3802_v61  ;;  %v851_v25 = vpop.f32.mrb[16].mxu1  ;;  %v1452_v26 = vmul.f32 0.5, %v1388_v48 }
 0x19f   : > { %v3816_v27 = vpop.eup %3073  ;;  %v1219_v28 = vadd.f32 %v1155_v17, %v3784_v45  ;;  %v1159_v29 = vmul.f32 0.044715, %v1095_v19  ;;  %v3820_v31 = vadd.f32 %v851_v25, %v3685_v6  ;;  %v853_v34 = vpop.f32.mrb[17].mxu1  ;;  %v1456_v35 = vmul.f32 0.5, %v1392_v20 }
 0x1a0   : > { %v3822_v36 = vpop.eup %3075  ;;  %v1220_v37 = vadd.f32 %v1156_v23, %v3788_v50  ;;  %v1160_v39 = vmul.f32 0.044715, %v1096_v24  ;;  %v3826_v41 = vadd.f32 %v853_v34, %v3690_v7  ;;  %v855_v43 = vpop.f32.mrb[18].mxu1  ;;  %v1516_v47 = vmul.f32 %v1452_v26, %v3696_v11 }
 0x1a1   : > { %v1283_v48 = vmul.f32 0.7978846, %v1219_v28  ;;  %v1223_v4 = vadd.f32 %v1159_v29, %v3796_v53  ;;  %v1035_v49 = vmul.f32 %v3820_v31, %v3820_v31  ;;  %v3833_v51 = vadd.f32 %v855_v43, %v3685_v6  ;;  %v857_v42 = vpop.f32.mrb[19].mxu1 }
 0x1a2   : > { %v1284_v46 = vmul.f32 0.7978846, %v1220_v37  ;;  %v1224_v52 = vadd.f32 %v1160_v39, %v3802_v61  ;;  %v1036_v54 = vmul.f32 %v3826_v41, %v3826_v41  ;;  %v3839_v55 = vadd.f32 %v857_v42, %v3690_v7 }
 0x1a3   : > { %3085 = vtanh.f32 %v1283_v48  ;;  %v1287_v11 = vmul.f32 0.7978846, %v1223_v4  ;;  %v1099_v57 = vmul.f32 %v1035_v49, %v3820_v31  ;;  %v1039_v58 = vmul.f32 %v3833_v51, %v3833_v51 }
 0x1a4   : > { %3087 = vtanh.f32 %v1284_v46  ;;  %v1288_v60 = vmul.f32 0.7978846, %v1224_v52  ;;  %v1100_v62 = vmul.f32 %v1036_v54, %v3826_v41  ;;  %v1040_v63 = vmul.f32 %v3839_v55, %v3839_v55  ;;  %v3013_v54 = vld [vmem:[#allocation7 + $0x100] ss:$8 sps:$4 sm:$0xff]  }
 0x1a5   : > { %v3847_v1 = vpop.eup %3077  ;;  %3089 = vtanh.f32 %v1287_v11  ;;  %v1163_v8 = vmul.f32 0.044715, %v1099_v57  ;;  %v1103_v10 = vmul.f32 %v1039_v58, %v3833_v51  ;;  %v1520_v12 = vmul.f32 %v1456_v35, %v3706_v18 }
 0x1a6   : > { %v3851_v17 = vpop.eup %3079  ;;  %3091 = vtanh.f32 %v1288_v60  ;;  %v1164_v19 = vmul.f32 0.044715, %v1100_v62  ;;  %v1104_v20 = vmul.f32 %v1040_v63, %v3839_v55  ;;  %v1451_v23 = vmul.f32 0.5, %v3780_v38  ;;  %v861_v24 = vpop.f32.mrb[20].mxu1  ;;  %v3018_v60 = vld [vmem:[#allocation7 + $0x114] ss:$8 sps:$4 sm:$0xff]  }
 0x1a7   : > { %v3855_v25 = vpop.eup %3081  ;;  %v1227_v26 = vadd.f32 %v1163_v8, %v3820_v31  ;;  %v1167_v28 = vmul.f32 0.044715, %v1103_v10  ;;  %v1580_v29 = vpack.c.bf16 %v1520_v12, %v1516_v47  ;;  %v1455_v34 = vmul.f32 0.5, %v3790_v15  ;;  %v863_v37 = vpop.f32.mrb[21].mxu1  ;;  %v3016_v12 = vld [vmem:[#allocation7 + $0x110] ss:$8 sps:$4 sm:$0xff]  }
 0x1a8   : > { %v3859_v39 = vpop.eup %3083  ;;  %v1228_v18 = vadd.f32 %v1164_v19, %v3826_v41  ;;  %v1168_v35 = vmul.f32 0.044715, %v1104_v20  ;;  %v1515_v43 = vmul.f32 %v1451_v23, %v3693_v9  ;;  %v3864_v48 = vadd.f32 %v861_v24, %v3685_v6  ;;  %v865_v38 = vpop.f32.mrb[22].mxu1 }
 0x1a9   : > { %v1291_v4 = vmul.f32 0.7978846, %v1227_v26  ;;  %v1231_v49 = vadd.f32 %v1167_v28, %v3833_v51  ;;  %2039 = vmatprep.mubr.bf16.mxu0 %v1580_v29  ;;  %v1519_v47 = vmul.f32 %v1455_v34, %v3701_v14  ;;  %v3869_v15 = vadd.f32 %v863_v37, %v3690_v7  ;;  %v867_v42 = vpop.f32.mrb[23].mxu1  ;;  %v3021_v34 = vld [vmem:[#allocation7 + $0x124] ss:$8 sps:$4 sm:$0xff]  }
 0x1aa   : > { %v1292_v46 = vmul.f32 0.7978846, %v1228_v18  ;;  %v1232_v52 = vadd.f32 %v1168_v35, %v3839_v55  ;;  %v1043_v9 = vmul.f32 %v3864_v48, %v3864_v48  ;;  %v3875_v11 = vadd.f32 %v865_v38, %v3685_v6 }
 0x1ab   : > { %3093 = vtanh.f32 %v1291_v4  ;;  %v1295_v57 = vmul.f32 0.7978846, %v1231_v49  ;;  %v1579_v58 = vpack.c.bf16 %v1519_v47, %v1515_v43  ;;  %v1044_v14 = vmul.f32 %v3869_v15, %v3869_v15 }
 0x1ac   : > { %3095 = vtanh.f32 %v1292_v46  ;;  %v1296_v62 = vmul.f32 0.7978846, %v1232_v52  ;;  %v1107_v63 = vmul.f32 %v1043_v9, %v3864_v48  ;;  %v1047_v8 = vmul.f32 %v3875_v11, %v3875_v11 }
 0x1ad   : > { %v3882_v10 = vpop.eup %3085  ;;  %3097 = vtanh.f32 %v1295_v57  ;;  %2040 = vmatmul.mubr.bf16.vlgmr.msra.gmra.mrb[0].mxu0 %v1579_v58  ;;  %v1108_v19 = vmul.f32 %v1044_v14, %v3869_v15  ;;  %v3886_v20 = vadd.f32 %v867_v42, %v3690_v7  ;;  %v1396_v23 = vadd.f32 1.0, %v3813_v22 }
 0x1ae   : > { %v3889_v24 = vpop.eup %3087  ;;  %3099 = vtanh.f32 %v1296_v62  ;;  %2121 = vmatpush1.bf16.msra.mxu0 %v3013_v54  ;;  %v1171_v26 = vmul.f32 0.044715, %v1107_v63  ;;  %v1111_v28 = vmul.f32 %v1047_v8, %v3875_v11  ;;  %v1400_v29 = vadd.f32 1.0, %v3822_v36  ;;  %v871_v37 = vpop.f32.mrb[24].mxu1  ;;  %v3019_v8 = vld [vmem:[#allocation7 + $0x120] ss:$8 sps:$4 sm:$0xff]  }
 0x1af   : > { %v3893_v18 = vpop.eup %3089  ;;  %2122 = vmatprep.subr.bf16.mxu0 %v3018_v60  ;;  %v1172_v35 = vmul.f32 0.044715, %v1108_v19  ;;  %v1048_v43 = vmul.f32 %v3886_v20, %v3886_v20  ;;  %v1460_v38 = vmul.f32 0.5, %v1396_v23  ;;  %v1395_v22 = vadd.f32 1.0, %v3810_v16  ;;  %v873_v4 = vpop.f32.mrb[25].mxu1 }
 0x1b0   : > { %v3898_v49 = vpop.eup %3091  ;;  %v1235_v47 = vadd.f32 %v1171_v26, %v3864_v48  ;;  %v1175_v42 = vmul.f32 0.044715, %v1111_v28  ;;  %v1464_v46 = vmul.f32 0.5, %v1400_v29  ;;  %v1399_v36 = vadd.f32 1.0, %v3816_v27  ;;  %v875_v52 = vpop.f32.mrb[26].mxu1 }
 0x1b1   : > { %v1236_v54 = vadd.f32 %v1172_v35, %v3869_v15  ;;  %v1112_v9 = vmul.f32 %v1048_v43, %v3886_v20  ;;  %v1524_v57 = vmul.f32 %v1460_v38, %v3721_v33  ;;  %v1459_v58 = vmul.f32 0.5, %v1395_v22  ;;  %v877_v60 = vpop.f32.mrb[27].mxu1  ;;  %v3024_v28 = vld [vmem:[#allocation7 + $0x134] ss:$8 sps:$4 sm:$0xff]   ;;  %v3022_v38 = vld [vmem:[#allocation7 + $0x130] ss:$8 sps:$4 sm:$0xff]  }
 0x1b2   : > { %v1299_v14 = vmul.f32 0.7978846, %v1235_v47  ;;  %2123 = vmatpush1.bf16.msra.mxu0 %v3016_v12  ;;  %v1239_v16 = vadd.f32 %v1175_v42, %v3875_v11  ;;  %v1528_v62 = vmul.f32 %v1464_v46, %v3734_v44  ;;  %v1463_v63 = vmul.f32 0.5, %v1399_v36 }
 0x1b3   : > { %v1300_v19 = vmul.f32 0.7978846, %v1236_v54  ;;  %v1176_v23 = vmul.f32 0.044715, %v1112_v9  ;;  %v1523_v27 = vmul.f32 %v1459_v58, %v3718_v30  ;;  %2124 = vmatprep.subr.bf16.mxu0 %v3021_v34  ;;  %v3909_v26 = vadd.f32 %v871_v37, %v3685_v6  ;;  %v3027_v9 = vld [vmem:[#allocation7 + $0x144] ss:$8 sps:$4 sm:$0xff]  }
 0x1b4   : > { %3101 = vtanh.f32 %v1299_v14  ;;  %v1303_v33 = vmul.f32 0.7978846, %v1239_v16  ;;  %v1584_v29 = vpack.c.bf16 %v1528_v62, %v1524_v57  ;;  %v1527_v12 = vmul.f32 %v1463_v63, %v3729_v40 }
 0x1b5   : > { %v3912_v35 = vpop.eup %3093  ;;  %3103 = vtanh.f32 %v1300_v19  ;;  %v1240_v44 = vadd.f32 %v1176_v23, %v3886_v20  ;;  %v1051_v43 = vmul.f32 %v3909_v26, %v3909_v26  ;;  %v3918_v30 = vadd.f32 %v873_v4, %v3690_v7 }
 0x1b6   : > { %v3920_v34 = vpop.eup %3095  ;;  %3105 = vtanh.f32 %v1303_v33  ;;  %2049 = vmatprep.mubr.bf16.mxu0 %v1584_v29  ;;  %v1583_v37 = vpack.c.bf16 %v1527_v12, %v1523_v27  ;;  %2125 = vmatpush1.bf16.msra.mxu0 %v3019_v8  ;;  %v3923_v40 = vadd.f32 %v875_v52, %v3685_v6  ;;  %v3926_v22 = vadd.f32 %v877_v60, %v3690_v7  ;;  %v881_v47 = vpop.f32.mrb[28].mxu1  ;;  %v3025_v29 = vld [vmem:[#allocation7 + $0x140] ss:$8 sps:$4 sm:$0xff]  }
 0x1b7   : > { %v3928_v42 = vpop.eup %3097  ;;  %v1304_v46 = vmul.f32 0.7978846, %v1240_v44  ;;  %v1115_v4 = vmul.f32 %v1051_v43, %v3909_v26  ;;  %2126 = vmatprep.subr.bf16.mxu0 %v3024_v28  ;;  %v1052_v36 = vmul.f32 %v3918_v30, %v3918_v30  ;;  %v1404_v54 = vadd.f32 1.0, %v3851_v17  ;;  %v883_v57 = vpop.f32.mrb[29].mxu1  ;;  %v3030_v43 = vld [vmem:[#allocation7 + $0x154] ss:$8 sps:$4 sm:$0xff]  }
 0x1b8   : > { %v3934_v58 = vpop.eup %3099  ;;  %2050 = vmatmul.mubr.bf16.gmra.mrb[4].mxu0 %v1583_v37  ;;  %v1055_v52 = vmul.f32 %v3923_v40, %v3923_v40  ;;  %v1056_v60 = vmul.f32 %v3926_v22, %v3926_v22  ;;  %v1408_v14 = vadd.f32 1.0, %v3859_v39  ;;  %v1403_v16 = vadd.f32 1.0, %v3847_v1  ;;  %v885_v62 = vpop.f32.mrb[30].mxu1 }
 0x1b9   : > { %3107 = vtanh.f32 %v1304_v46  ;;  %v1179_v63 = vmul.f32 0.044715, %v1115_v4  ;;  %v1116_v17 = vmul.f32 %v1052_v36, %v3918_v30  ;;  %v1468_v8 = vmul.f32 0.5, %v1404_v54  ;;  %v887_v19 = vpop.f32.mrb[31].mxu1 }
 0x1ba   : > { %2127 = vmatpush1.bf16.msra.mxu0 %v3022_v38  ;;  %v1119_v23 = vmul.f32 %v1055_v52, %v3923_v40  ;;  %v1120_v27 = vmul.f32 %v1056_v60, %v3926_v22  ;;  %v1472_v28 = vmul.f32 0.5, %v1408_v14  ;;  %v1407_v33 = vadd.f32 1.0, %v3855_v25 }
 0x1bb   : > { %v1243_v39 = vadd.f32 %v1179_v63, %v3909_v26  ;;  %v1180_v12 = vmul.f32 0.044715, %v1116_v17  ;;  %v1532_v1 = vmul.f32 %v1468_v8, %v3755_v0  ;;  %v1467_v44 = vmul.f32 0.5, %v1403_v16  ;;  %2128 = vmatprep.subr.bf16.mxu0 %v3027_v9 }
 0x1bc   : > { %v1183_v37 = vmul.f32 0.044715, %v1119_v23  ;;  %v1184_v46 = vmul.f32 0.044715, %v1120_v27  ;;  %v1536_v38 = vmul.f32 %v1472_v28, %v3767_v21  ;;  %v1471_v4 = vmul.f32 0.5, %v1407_v33 }
 0x1bd   : > { %v1307_v36 = vmul.f32 0.7978846, %v1243_v39  ;;  %v1244_v54 = vadd.f32 %v1180_v12, %v3918_v30  ;;  %v1531_v52 = vmul.f32 %v1467_v44, %v3750_v59  ;;  %v3952_v25 = vadd.f32 %v881_v47, %v3685_v6  ;;  %v3028_v21 = vld [vmem:[#allocation7 + $0x150] ss:$8 sps:$4 sm:$0xff]   ;;  %v3033_v23 = vld [vmem:[#allocation7 + $0x164] ss:$8 sps:$4 sm:$0xff]  }
 0x1be   : > { %v3954_v60 = vpop.eup %3101  ;;  %v1247_v0 = vadd.f32 %v1183_v37, %v3923_v40  ;;  %v1248_v9 = vadd.f32 %v1184_v46, %v3926_v22  ;;  %v1588_v14 = vpack.c.bf16 %v1536_v38, %v1532_v1  ;;  %v1535_v16 = vmul.f32 %v1471_v4, %v3761_v13  ;;  %2129 = vmatpush1.bf16.msra.mxu0 %v3025_v29  ;;  %v924_v63 = vpop.f32.mrb[32].mxu1 }
 0x1bf   : > { %v3959_v17 = vpop.eup %3103  ;;  %3109 = vtanh.f32 %v1307_v36  ;;  %v1308_v8 = vmul.f32 0.7978846, %v1244_v54  ;;  %v1059_v59 = vmul.f32 %v3952_v25, %v3952_v25  ;;  %2130 = vmatprep.subr.bf16.mxu0 %v3030_v43  ;;  %v3964_v47 = vadd.f32 %v883_v57, %v3690_v7  ;;  %v3966_v27 = vpop.f32.mrb[33].mxu1 }
 0x1c0   : > { %v3968_v28 = vpop.eup %3105  ;;  %v1311_v13 = vmul.f32 0.7978846, %v1247_v0  ;;  %v1312_v33 = vmul.f32 0.7978846, %v1248_v9  ;;  %2059 = vmatprep.mubr.bf16.mxu0 %v1588_v14  ;;  %v1587_v29 = vpack.c.bf16 %v1535_v16, %v1531_v52  ;;  %v3971_v39 = vadd.f32 %v885_v62, %v3685_v6  ;;  %v928_v12 = vpop.f32.mrb[34].mxu1 }
 0x1c1   : > { %3111 = vtanh.f32 %v1308_v8  ;;  %v1123_v1 = vmul.f32 %v1059_v59, %v3952_v25  ;;  %v1060_v57 = vmul.f32 %v3964_v47, %v3964_v47  ;;  %v3977_v44 = vadd.f32 %v887_v19, %v3690_v7  ;;  %v930_v43 = vpop.f32.mrb[35].mxu1  ;;  %v3031_v19 = vld [vmem:[#allocation7 + $0x160] ss:$8 sps:$4 sm:$0xff]  }
 0x1c2   : > { %3113 = vtanh.f32 %v1311_v13  ;;  %2060 = vmatmul.mubr.bf16.gmra.mrb[8].mxu0 %v1587_v29  ;;  %v1063_v37 = vmul.f32 %v3971_v39, %v3971_v39  ;;  %v1412_v46 = vadd.f32 1.0, %v3889_v24  ;;  %v1416_v6 = vadd.f32 1.0, %v3898_v49  ;;  %v3036_v24 = vld [vmem:[#allocation7 + $0x174] ss:$8 sps:$4 sm:$0xff]  }
 0x1c3   : > { %v3983_v62 = vpop.eup %3107  ;;  %3115 = vtanh.f32 %v1312_v33  ;;  %v1187_v38 = vmul.f32 0.044715, %v1123_v1  ;;  %v1124_v4 = vmul.f32 %v1060_v57, %v3964_v47  ;;  %2131 = vmatpush1.bf16.msra.mxu0 %v3028_v21  ;;  %v1064_v7 = vmul.f32 %v3977_v44, %v3977_v44  ;;  %v3034_v33 = vld [vmem:[#allocation7 + $0x170] ss:$8 sps:$4 sm:$0xff]  }
 0x1c4   : > { %v1127_v36 = vmul.f32 %v1063_v37, %v3971_v39  ;;  %v1476_v54 = vmul.f32 0.5, %v1412_v46  ;;  %v1480_v52 = vmul.f32 0.5, %v1416_v6  ;;  %v1411_v0 = vadd.f32 1.0, %v3882_v10  ;;  %2132 = vmatprep.subr.bf16.mxu0 %v3033_v23 }
 0x1c5   : > { %v1251_v49 = vadd.f32 %v1187_v38, %v3952_v25  ;;  %v1188_v9 = vmul.f32 0.044715, %v1124_v4  ;;  %v1128_v14 = vmul.f32 %v1064_v7, %v3977_v44  ;;  %v1415_v16 = vadd.f32 1.0, %v3893_v18 }
 0x1c6   : > { %v1191_v21 = vmul.f32 0.044715, %v1127_v36  ;;  %v1540_v8 = vmul.f32 %v1476_v54, %v3788_v50  ;;  %v1544_v59 = vmul.f32 %v1480_v52, %v3802_v61  ;;  %v1475_v13 = vmul.f32 0.5, %v1411_v0  ;;  %v3995_v29 = vpop.f32.mrb[36].mxu1  ;;  %v3039_v61 = vld [vmem:[#allocation7 + $0x184] ss:$8 sps:$4 sm:$0xff]  }
 0x1c7   : > { %v1315_v1 = vmul.f32 0.7978846, %v1251_v49  ;;  %v1252_v10 = vadd.f32 %v1188_v9, %v3964_v47  ;;  %v1192_v23 = vmul.f32 0.044715, %v1128_v14  ;;  %v1479_v57 = vmul.f32 0.5, %v1415_v16  ;;  %2133 = vmatpush1.bf16.msra.mxu0 %v3031_v19  ;;  %v3998_v37 = vpop.f32.mrb[37].mxu1 }
 0x1c8   : > { %v1255_v46 = vadd.f32 %v1191_v21, %v3971_v39  ;;  %v1592_v18 = vpack.c.bf16 %v1544_v59, %v1540_v8  ;;  %v1539_v6 = vmul.f32 %v1475_v13, %v3784_v45  ;;  %v4003_v50 = vadd.f32 %v924_v63, %v3746_v56  ;;  %2134 = vmatprep.subr.bf16.mxu0 %v3036_v24  ;;  %v4005_v38 = vpop.f32.mrb[38].mxu1  ;;  %v3037_v14 = vld [vmem:[#allocation7 + $0x180] ss:$8 sps:$4 sm:$0xff]   ;;  %v3042_v8 = vld [vmem:[#allocation7 + $0x194] ss:$8 sps:$4 sm:$0xff]  }
 0x1c9   : > { %v4007_v4 = vpop.eup %3109  ;;  %3117 = vtanh.f32 %v1315_v1  ;;  %v1316_v7 = vmul.f32 0.7978846, %v1252_v10  ;;  %v1256_v19 = vadd.f32 %v1192_v23, %v3977_v44  ;;  %v1543_v36 = vmul.f32 %v1479_v57, %v3796_v53  ;;  %v4011_v54 = vpop.f32.mrb[39].mxu1 }
 0x1ca   : > { %v1319_v52 = vmul.f32 0.7978846, %v1255_v46  ;;  %2069 = vmatprep.mubr.bf16.mxu0 %v1592_v18  ;;  %v1005_v45 = vmul.f32 %v4003_v50, %v4003_v50  ;;  %v4017_v63 = vadd.f32 %v3966_v27, %v3777_v32  ;;  %v4020_v0 = vadd.f32 %v928_v12, %v3746_v56  ;;  %v3040_v46 = vld [vmem:[#allocation7 + $0x190] ss:$8 sps:$4 sm:$0xff]  }
 0x1cb   : > { %v4022_v24 = vpop.eup %3111  ;;  %3119 = vtanh.f32 %v1316_v7  ;;  %v1320_v49 = vmul.f32 0.7978846, %v1256_v19  ;;  %v1591_v9 = vpack.c.bf16 %v1543_v36, %v1539_v6  ;;  %2135 = vmatpush1.bf16.msra.mxu0 %v3034_v33  ;;  %v4025_v53 = vadd.f32 %v930_v43, %v3777_v32 }
 0x1cc   : > { %v4027_v16 = vpop.eup %3113  ;;  %3121 = vtanh.f32 %v1319_v52  ;;  %v1069_v21 = vmul.f32 %v1005_v45, %v4003_v50  ;;  %v1006_v27 = vmul.f32 %v4017_v63, %v4017_v63  ;;  %v1009_v12 = vmul.f32 %v4020_v0, %v4020_v0  ;;  %2136 = vmatprep.subr.bf16.mxu0 %v3039_v61 }
 0x1cd   : > { %v4034_v59 = vpop.eup %3115  ;;  %3123 = vtanh.f32 %v1320_v49  ;;  %2070 = vmatmul.mubr.bf16.gmra.mrb[12].mxu0 %v1591_v9  ;;  %v1010_v43 = vmul.f32 %v4025_v53, %v4025_v53  ;;  %v1420_v13 = vadd.f32 1.0, %v3920_v34  ;;  %v1424_v33 = vadd.f32 1.0, %v3934_v58  ;;  %v3045_v34 = vld [vmem:[#allocation7 + $0x1a4] ss:$8 sps:$4 sm:$0xff]  }
 0x1ce   : > { %v1133_v1 = vmul.f32 0.044715, %v1069_v21  ;;  %v1070_v10 = vmul.f32 %v1006_v27, %v4017_v63  ;;  %v1073_v23 = vmul.f32 %v1009_v12, %v4020_v0  ;;  %v1419_v57 = vadd.f32 1.0, %v3912_v35  ;;  %v4043_v18 = vpop.f32.mrb[40].mxu1 }
 0x1cf   : > { %v1074_v6 = vmul.f32 %v1010_v43, %v4025_v53  ;;  %v1484_v61 = vmul.f32 0.5, %v1420_v13  ;;  %v1488_v7 = vmul.f32 0.5, %v1424_v33  ;;  %v1423_v19 = vadd.f32 1.0, %v3928_v42  ;;  %2137 = vmatpush1.bf16.msra.mxu0 %v3037_v14  ;;  %v4047_v36 = vpop.f32.mrb[41].mxu1 }
 0x1d0   : > { %v1197_v58 = vadd.f32 %v1133_v1, %v4003_v50  ;;  %v1134_v52 = vmul.f32 0.044715, %v1070_v10  ;;  %v1137_v45 = vmul.f32 0.044715, %v1073_v23  ;;  %v1483_v49 = vmul.f32 0.5, %v1419_v57  ;;  %2138 = vmatprep.subr.bf16.mxu0 %v3042_v8  ;;  %v4050_v35 = vpop.f32.mrb[42].mxu1 }
 0x1d1   : > { %v1138_v9 = vmul.f32 0.044715, %v1074_v6  ;;  %v1548_v21 = vmul.f32 %v1484_v61, %v3826_v41  ;;  %v1552_v27 = vmul.f32 %v1488_v7, %v3839_v55  ;;  %v1487_v12 = vmul.f32 0.5, %v1423_v19  ;;  %v4054_v43 = vpop.f32.mrb[43].mxu1 }
 0x1d2   : > { %v1261_v42 = vmul.f32 0.7978846, %v1197_v58  ;;  %v1198_v14 = vadd.f32 %v1134_v52, %v4017_v63  ;;  %v1201_v13 = vadd.f32 %v1137_v45, %v4020_v0  ;;  %v1547_v33 = vmul.f32 %v1483_v49, %v3820_v31  ;;  %v3043_v31 = vld [vmem:[#allocation7 + $0x1a0] ss:$8 sps:$4 sm:$0xff]  }
 0x1d3   : > { %v4059_v1 = vpop.eup %3117  ;;  %v1202_v8 = vadd.f32 %v1138_v9, %v4025_v53  ;;  %v1596_v10 = vpack.c.bf16 %v1552_v27, %v1548_v21  ;;  %v1551_v23 = vmul.f32 %v1487_v12, %v3833_v51  ;;  %v4065_v41 = vadd.f32 %v3995_v29, %v3746_v56  ;;  %2139 = vmatpush1.bf16.msra.mxu0 %v3040_v46  ;;  %v3048_v46 = vld [vmem:[#allocation7 + $0x1b4] ss:$8 sps:$4 sm:$0xff]  }
 0x1d4   : > { %3125 = vtanh.f32 %v1261_v42  ;;  %v1262_v55 = vmul.f32 0.7978846, %v1198_v14  ;;  %v1265_v57 = vmul.f32 0.7978846, %v1201_v13  ;;  %v4069_v6 = vadd.f32 %v3998_v37, %v3777_v32  ;;  %2140 = vmatprep.subr.bf16.mxu0 %v3045_v34  ;;  %v3046_v42 = vld [vmem:[#allocation7 + $0x1b0] ss:$8 sps:$4 sm:$0xff]  }
 0x1d5   : > { %v4071_v61 = vpop.eup %3119  ;;  %v1266_v7 = vmul.f32 0.7978846, %v1202_v8  ;;  %2079 = vmatprep.mubr.bf16.mxu0 %v1596_v10  ;;  %v1595_v19 = vpack.c.bf16 %v1551_v23, %v1547_v33  ;;  %v1013_v51 = vmul.f32 %v4065_v41, %v4065_v41  ;;  %v4077_v29 = vadd.f32 %v4005_v38, %v3746_v56  ;;  %v3051_v14 = vld [vmem:[#allocation7 + $0x1c4] ss:$8 sps:$4 sm:$0xff]  }
 0x1d6   : > { %v4079_v58 = vpop.eup %3121  ;;  %3127 = vtanh.f32 %v1262_v55  ;;  %v1014_v37 = vmul.f32 %v4069_v6, %v4069_v6  ;;  %v4085_v34 = vadd.f32 %v4011_v54, %v3777_v32  ;;  %v1428_v52 = vadd.f32 1.0, %v3959_v17  ;;  %v4088_v45 = vpop.f32.mrb[44].mxu1 }
 0x1d7   : > { %v4090_v49 = vpop.eup %3123  ;;  %3129 = vtanh.f32 %v1265_v57  ;;  %2080 = vmatmul.mubr.bf16.gmra.mrb[16].mxu0 %v1595_v19  ;;  %v1077_v38 = vmul.f32 %v1013_v51, %v4065_v41  ;;  %v1017_v9 = vmul.f32 %v4077_v29, %v4077_v29  ;;  %v1432_v21 = vadd.f32 1.0, %v3983_v62  ;;  %v4096_v27 = vpop.f32.mrb[45].mxu1 }
 0x1d8   : > { %3131 = vtanh.f32 %v1266_v7  ;;  %v1078_v54 = vmul.f32 %v1014_v37, %v4069_v6  ;;  %v1018_v17 = vmul.f32 %v4085_v34, %v4085_v34  ;;  %v1492_v12 = vmul.f32 0.5, %v1428_v52  ;;  %2141 = vmatpush1.bf16.msra.mxu0 %v3043_v31  ;;  %v4101_v13 = vpop.f32.mrb[46].mxu1 }
 0x1d9   : > { %v1141_v33 = vmul.f32 0.044715, %v1077_v38  ;;  %v1081_v8 = vmul.f32 %v1017_v9, %v4077_v29  ;;  %v1496_v10 = vmul.f32 0.5, %v1432_v21  ;;  %v1427_v62 = vadd.f32 1.0, %v3954_v60  ;;  %2142 = vmatprep.subr.bf16.mxu0 %v3048_v46  ;;  %v4105_v23 = vpop.f32.mrb[47].mxu1 }
 0x1da   : > { %v1142_v55 = vmul.f32 0.044715, %v1078_v54  ;;  %v1082_v57 = vmul.f32 %v1018_v17, %v4085_v34  ;;  %v1556_v7 = vmul.f32 %v1492_v12, %v3869_v15  ;;  %v1431_v31 = vadd.f32 1.0, %v3968_v28  ;;  %v3049_v21 = vld [vmem:[#allocation7 + $0x1c0] ss:$8 sps:$4 sm:$0xff]  }
 0x1db   : > { %v1205_v19 = vadd.f32 %v1141_v33, %v4065_v41  ;;  %v1145_v51 = vmul.f32 0.044715, %v1081_v8  ;;  %v1560_v37 = vmul.f32 %v1496_v10, %v3886_v20  ;;  %v1491_v52 = vmul.f32 0.5, %v1427_v62  ;;  %v3054_v12 = vld [vmem:[#allocation7 + $0x1d4] ss:$8 sps:$4 sm:$0xff]  }
 0x1dc   : > { %v1206_v38 = vadd.f32 %v1142_v55, %v4069_v6  ;;  %v1146_v9 = vmul.f32 0.044715, %v1082_v57  ;;  %v1495_v60 = vmul.f32 0.5, %v1431_v31  ;;  %v4115_v46 = vadd.f32 %v4043_v18, %v3746_v56  ;;  %2143 = vmatpush1.bf16.msra.mxu0 %v3046_v42 }
 0x1dd   : > { %v1269_v54 = vmul.f32 0.7978846, %v1205_v19  ;;  %v1209_v15 = vadd.f32 %v1145_v51, %v4077_v29  ;;  %v1600_v28 = vpack.c.bf16 %v1560_v37, %v1556_v7  ;;  %v1555_v17 = vmul.f32 %v1491_v52, %v3864_v48  ;;  %2144 = vmatprep.subr.bf16.mxu0 %v3051_v14  ;;  %v3052_v19 = vld [vmem:[#allocation7 + $0x1d0] ss:$8 sps:$4 sm:$0xff]  }
 0x1de   : > { %v3126_v20 = vpop.eup %3125  ;;  %v1270_v33 = vmul.f32 0.7978846, %v1206_v38  ;;  %v1210_v8 = vadd.f32 %v1146_v9, %v4085_v34  ;;  %v1559_v10 = vmul.f32 %v1495_v60, %v3875_v11  ;;  %v1021_v18 = vmul.f32 %v4115_v46, %v4115_v46  ;;  %v4123_v62 = vpop.f32.mrb[48].mxu1  ;;  %v3057_v9 = vld [vmem:[#allocation7 + $0x1e4] ss:$8 sps:$4 sm:$0xff]  }
 0x1df   : > { %v1389_v42 = vadd.f32 1.0, %v3126_v20  ;;  %3133 = vtanh.f32 %v1269_v54  ;;  %v1273_v55 = vmul.f32 0.7978846, %v1209_v15  ;;  %2089 = vmatprep.mubr.bf16.mxu0 %v1600_v28  ;;  %v4127_v48 = vadd.f32 %v4047_v36, %v3777_v32  ;;  %v4129_v14 = vpop.f32.mrb[49].mxu1 }
 0x1e0   : > { %v4131_v57 = vpop.eup %3127  ;;  %3135 = vtanh.f32 %v1270_v33  ;;  %v1274_v7 = vmul.f32 0.7978846, %v1210_v8  ;;  %v1599_v11 = vpack.c.bf16 %v1559_v10, %v1555_v17  ;;  %v1085_v31 = vmul.f32 %v1021_v18, %v4115_v46  ;;  %2145 = vmatpush1.bf16.msra.mxu0 %v3049_v21  ;;  %v4134_v51 = vpop.f32.mrb[50].mxu1 }
 0x1e1   : > { %v3130_v37 = vpop.eup %3129  ;;  %v1453_v52 = vmul.f32 0.5, %v1389_v42  ;;  %3137 = vtanh.f32 %v1273_v55  ;;  %v1022_v36 = vmul.f32 %v4127_v48, %v4127_v48  ;;  %v4140_v38 = vadd.f32 %v4050_v35, %v3746_v56  ;;  %2146 = vmatprep.subr.bf16.mxu0 %v3054_v12  ;;  %v4142_v60 = vpop.f32.mrb[51].mxu1 }
 0x1e2   : > { %v4144_v54 = vpop.eup %3131  ;;  %v1393_v21 = vadd.f32 1.0, %v3130_v37  ;;  %3139 = vtanh.f32 %v1274_v7  ;;  %2090 = vmatmul.mubr.bf16.gmra.mrb[20].mxu0 %v1599_v11  ;;  %v1149_v15 = vmul.f32 0.044715, %v1085_v31  ;;  %v4148_v28 = vadd.f32 %v4054_v43, %v3777_v32  ;;  %v3055_v43 = vld [vmem:[#allocation7 + $0x1e0] ss:$8 sps:$4 sm:$0xff]  }
 0x1e3   : > { %v4151_v17 = vmul.f32 %v1453_v52, %v4003_v50  ;;  %v1086_v35 = vmul.f32 %v1022_v36, %v4127_v48  ;;  %v1025_v12 = vmul.f32 %v4140_v38, %v4140_v38  ;;  %v1436_v20 = vadd.f32 1.0, %v4022_v24  ;;  %v3060_v11 = vld [vmem:[#allocation7 + $0x1f4] ss:$8 sps:$4 sm:$0xff]  }
 0x1e4   : > { %v1457_v33 = vmul.f32 0.5, %v1393_v21  ;;  %v1213_v8 = vadd.f32 %v1149_v15, %v4115_v46  ;;  %v1026_v10 = vmul.f32 %v4148_v28, %v4148_v28  ;;  %v1440_v18 = vadd.f32 1.0, %v4034_v59  ;;  %2147 = vmatpush1.bf16.msra.mxu0 %v3052_v19 }
 0x1e5   : > { %v1150_v42 = vmul.f32 0.044715, %v1086_v35  ;;  %v1089_v50 = vmul.f32 %v1025_v12, %v4140_v38  ;;  %v1500_v55 = vmul.f32 0.5, %v1436_v20  ;;  %v1435_v7 = vadd.f32 1.0, %v4007_v4  ;;  %2148 = vmatprep.subr.bf16.mxu0 %v3057_v9  ;;  %v3058_v12 = vld [vmem:[#allocation7 + $0x1f0] ss:$8 sps:$4 sm:$0xff]  }
 0x1e6   : > { %v4164_v24 = vmul.f32 %v1457_v33, %v4020_v0  ;;  %v1277_v31 = vmul.f32 0.7978846, %v1213_v8  ;;  %v1090_v37 = vmul.f32 %v1026_v10, %v4148_v28  ;;  %v1504_v52 = vmul.f32 0.5, %v1440_v18  ;;  %v4167_v36 = vpop.f32.mrb[52].mxu1 }
 0x1e7   : > { %v1214_v59 = vadd.f32 %v1150_v42, %v4127_v48  ;;  %v1153_v19 = vmul.f32 0.044715, %v1089_v50  ;;  %v1564_v21 = vmul.f32 %v1500_v55, %v3918_v30  ;;  %v1439_v15 = vadd.f32 1.0, %v4027_v16  ;;  %v4172_v35 = vpop.f32.mrb[53].mxu1 }
 0x1e8   : > { %v1581_v4 = vpack.c.bf16 %v4164_v24, %v4151_v17  ;;  %3141 = vtanh.f32 %v1277_v31  ;;  %v1154_v0 = vmul.f32 0.044715, %v1090_v37  ;;  %v1568_v9 = vmul.f32 %v1504_v52, %v3926_v22  ;;  %2149 = vmatpush1.bf16.msra.mxu0 %v3055_v43  ;;  %v4177_v20 = vpop.f32.mrb[54].mxu1 }
 0x1e9   : > { %v4179_v33 = vpop.eup %3133  ;;  %v1278_v8 = vmul.f32 0.7978846, %v1214_v59  ;;  %v1217_v30 = vadd.f32 %v1153_v19, %v4140_v38  ;;  %v1499_v10 = vmul.f32 0.5, %v1435_v7  ;;  %v1503_v16 = vmul.f32 0.5, %v1439_v15  ;;  %2150 = vmatprep.subr.bf16.mxu0 %v3060_v11  ;;  %v4182_v18 = vpop.f32.mrb[55].mxu1 }
 0x1ea   : > { %v4184_v42 = vpop.eup %3135  ;;  %v1218_v50 = vadd.f32 %v1154_v0, %v4148_v28  ;;  %v1604_v55 = vpack.c.bf16 %v1568_v9, %v1564_v21  ;;  %v4189_v22 = vadd.f32 %v4088_v45, %v3746_v56  ;;  %v4193_v43 = vadd.f32 %v4096_v27, %v3777_v32 }
 0x1eb   : > { %v4195_v31 = vpop.eup %3137  ;;  %3143 = vtanh.f32 %v1278_v8  ;;  %v1281_v7 = vmul.f32 0.7978846, %v1217_v30  ;;  %v1563_v11 = vmul.f32 %v1499_v10, %v3909_v26  ;;  %v1567_v37 = vmul.f32 %v1503_v16, %v3923_v40 }
 0x1ec   : > { %v4199_v52 = vpop.eup %3139  ;;  %v1282_v59 = vmul.f32 0.7978846, %v1218_v50  ;;  %2099 = vmatprep.mubr.bf16.mxu0 %v1604_v55  ;;  %v1029_v45 = vmul.f32 %v4189_v22, %v4189_v22  ;;  %v1030_v19 = vmul.f32 %v4193_v43, %v4193_v43  ;;  %v4207_v27 = vadd.f32 %v4101_v13, %v3746_v56  ;;  %2151 = vmatpush1.bf16.msra.mxu0 %v3058_v12 }
 0x1ed   : > { %3145 = vtanh.f32 %v1281_v7  ;;  %v1603_v21 = vpack.c.bf16 %v1567_v37, %v1563_v11  ;;  %v4211_v26 = vadd.f32 %v4105_v23, %v3777_v32  ;;  %v1444_v40 = vadd.f32 1.0, %v4071_v61 }
 0x1ee   : > { %3147 = vtanh.f32 %v1282_v59  ;;  %v1093_v15 = vmul.f32 %v1029_v45, %v4189_v22  ;;  %v1094_v0 = vmul.f32 %v1030_v19, %v4193_v43  ;;  %v1033_v9 = vmul.f32 %v4207_v27, %v4207_v27  ;;  %v4218_v8 = vpop.f32.mrb[56].mxu1 }
 0x1ef   : > { %2100 = vmatmul.mubr.bf16.gmra.mrb[24].mxu0 %v1603_v21  ;;  %v1034_v13 = vmul.f32 %v4211_v26, %v4211_v26  ;;  %v1448_v12 = vadd.f32 1.0, %v4090_v49  ;;  %v1508_v23 = vmul.f32 0.5, %v1444_v40  ;;  %v1443_v30 = vadd.f32 1.0, %v4059_v1  ;;  %v4224_v61 = vpop.f32.mrb[57].mxu1 }
 0x1f0   : > { %v1157_v10 = vmul.f32 0.044715, %v1093_v15  ;;  %v1158_v16 = vmul.f32 0.044715, %v1094_v0  ;;  %v1097_v50 = vmul.f32 %v1033_v9, %v4207_v27  ;;  %v1447_v55 = vadd.f32 1.0, %v4079_v58  ;;  %v4228_v7 = vpop.f32.mrb[58].mxu1 }
 0x1f1   : > { %v1098_v11 = vmul.f32 %v1034_v13, %v4211_v26  ;;  %v1512_v37 = vmul.f32 0.5, %v1448_v12  ;;  %v1572_v59 = vmul.f32 %v1508_v23, %v3964_v47  ;;  %v1507_v45 = vmul.f32 0.5, %v1443_v30  ;;  %v4232_v49 = vpop.f32.mrb[59].mxu1 }
 0x1f2   : > { %v4234_v19 = vpop.eup %3141  ;;  %v1221_v1 = vadd.f32 %v1157_v10, %v4189_v22  ;;  %v1222_v21 = vadd.f32 %v1158_v16, %v4193_v43  ;;  %v1161_v40 = vmul.f32 0.044715, %v1097_v50  ;;  %v1511_v15 = vmul.f32 0.5, %v1447_v55 }
 0x1f3   : > { %v1162_v0 = vmul.f32 0.044715, %v1098_v11  ;;  %v1576_v58 = vmul.f32 %v1512_v37, %v3977_v44  ;;  %v1571_v9 = vmul.f32 %v1507_v45, %v3952_v25  ;;  %v4242_v13 = vadd.f32 %v4123_v62, %v3746_v56 }
 0x1f4   : > { %v1285_v47 = vmul.f32 0.7978846, %v1221_v1  ;;  %v1286_v12 = vmul.f32 0.7978846, %v1222_v21  ;;  %v1225_v23 = vadd.f32 %v1161_v40, %v4207_v27  ;;  %v1575_v30 = vmul.f32 %v1511_v15, %v3971_v39 }
 0x1f5   : > { %v4246_v10 = vpop.eup %3143  ;;  %v1226_v16 = vadd.f32 %v1162_v0, %v4211_v26  ;;  %v1608_v50 = vpack.c.bf16 %v1576_v58, %v1572_v59  ;;  %v1037_v44 = vmul.f32 %v4242_v13, %v4242_v13  ;;  %v4253_v25 = vadd.f32 %v4129_v14, %v3777_v32 }
 0x1f6   : > { %3149 = vtanh.f32 %v1285_v47  ;;  %v1289_v62 = vmul.f32 0.7978846, %v1225_v23  ;;  %v1607_v55 = vpack.c.bf16 %v1575_v30, %v1571_v9  ;;  %v4257_v11 = vadd.f32 %v4134_v51, %v3746_v56  ;;  %v4259_v39 = vpop.f32.mrb[60].mxu1 }
 0x1f7   : > { %v4261_v37 = vpop.eup %3145  ;;  %3151 = vtanh.f32 %v1286_v12  ;;  %v1290_v59 = vmul.f32 0.7978846, %v1226_v16  ;;  %2109 = vmatprep.mubr.bf16.mxu0 %v1608_v50  ;;  %v1101_v45 = vmul.f32 %v1037_v44, %v4242_v13  ;;  %v1038_v14 = vmul.f32 %v4253_v25, %v4253_v25  ;;  %v4266_v1 = vpop.f32.mrb[61].mxu1 }
 0x1f8   : > { %v4268_v21 = vpop.eup %3147  ;;  %3153 = vtanh.f32 %v1289_v62  ;;  %2110 = vmatmul.mubr.bf16.gmra.mrb[28].mxu0 %v1607_v55  ;;  %v1041_v51 = vmul.f32 %v4257_v11, %v4257_v11  ;;  %v4274_v40 = vadd.f32 %v4142_v60, %v3777_v32  ;;  %v1390_v15 = vadd.f32 1.0, %v4131_v57  ;;  %v4277_v0 = vpop.f32.mrb[62].mxu1 }
 0x1f9   : > { %3155 = vtanh.f32 %v1290_v59  ;;  %v1165_v58 = vmul.f32 0.044715, %v1101_v45  ;;  %v1102_v9 = vmul.f32 %v1038_v14, %v4253_v25  ;;  %v1394_v47 = vadd.f32 1.0, %v4144_v54  ;;  %v4281_v12 = vpop.f32.mrb[63].mxu1 }
 0x1fa   : > { %v1105_v23 = vmul.f32 %v1041_v51, %v4257_v11  ;;  %v1042_v30 = vmul.f32 %v4274_v40, %v4274_v40  ;;  %v1454_v16 = vmul.f32 0.5, %v1390_v15  ;;  %v4288_v60 = vadd.f32 %v4167_v36, %v3746_v56 }
 0x1fb   : > { %v1229_v57 = vadd.f32 %v1165_v58, %v4242_v13  ;;  %v1166_v50 = vmul.f32 0.044715, %v1102_v9  ;;  %v1458_v44 = vmul.f32 0.5, %v1394_v47  ;;  %v4293_v62 = vadd.f32 %v4172_v35, %v3777_v32 }
 0x1fc   : > { %v1169_v54 = vmul.f32 0.044715, %v1105_v23  ;;  %v1106_v55 = vmul.f32 %v1042_v30, %v4274_v40  ;;  %v1518_v59 = vmul.f32 %v1454_v16, %v4017_v63  ;;  %v1045_v45 = vmul.f32 %v4288_v60, %v4288_v60 }
 0x1fd   : > { %v1293_v14 = vmul.f32 0.7978846, %v1229_v57  ;;  %v1230_v36 = vadd.f32 %v1166_v50, %v4253_v25  ;;  %v1522_v51 = vmul.f32 %v1458_v44, %v4025_v53  ;;  %v1046_v15 = vmul.f32 %v4293_v62, %v4293_v62 }
 0x1fe   : > { %v1233_v58 = vadd.f32 %v1169_v54, %v4257_v11  ;;  %v1170_v35 = vmul.f32 0.044715, %v1106_v55  ;;  %v1109_v9 = vmul.f32 %v1045_v45, %v4288_v60  ;;  %v4307_v47 = vadd.f32 %v4177_v20, %v3746_v56 }
 0x1ff   : > { %3157 = vtanh.f32 %v1293_v14  ;;  %v1294_v63 = vmul.f32 0.7978846, %v1230_v36  ;;  %v1582_v23 = vpack.c.bf16 %v1522_v51, %v1518_v59  ;;  %v1110_v30 = vmul.f32 %v1046_v15, %v4293_v62 }
 0x200   : > { %v4310_v16 = vpop.eup %3149  ;;  %v1297_v53 = vmul.f32 0.7978846, %v1233_v58  ;;  %v1234_v57 = vadd.f32 %v1170_v35, %v4274_v40  ;;  %v1173_v50 = vmul.f32 0.044715, %v1109_v9  ;;  %v1049_v44 = vmul.f32 %v4307_v47, %v4307_v47 }
 0x201   : > { %v4315_v54 = vpop.eup %3151  ;;  %3159 = vtanh.f32 %v1294_v63  ;;  %2152 = vmatprep.mubr.bf16.mxu0 %v1582_v23  ;;  %v1174_v20 = vmul.f32 0.044715, %v1110_v30  ;;  %v4319_v55 = vadd.f32 %v4182_v18, %v3777_v32  ;;  %v1398_v59 = vadd.f32 1.0, %v4184_v42 }
 0x202   : > { %v4322_v45 = vpop.eup %3153  ;;  %3161 = vtanh.f32 %v1297_v53  ;;  %v1298_v14 = vmul.f32 0.7978846, %v1234_v57  ;;  %2153 = vmatmul.mubr.bf16.vlgmr.msra.gmra.mrb[0].mxu0 %v1581_v4  ;;  %v1237_v36 = vadd.f32 %v1173_v50, %v4288_v60  ;;  %v1113_v51 = vmul.f32 %v1049_v44, %v4307_v47 }
 0x203   : > { %v4329_v15 = vpop.eup %3155  ;;  %v1238_v58 = vadd.f32 %v1174_v20, %v4293_v62  ;;  %v1050_v18 = vmul.f32 %v4319_v55, %v4319_v55  ;;  %v1402_v42 = vadd.f32 1.0, %v4199_v52  ;;  %v1462_v35 = vmul.f32 0.5, %v1398_v59 }
 0x204   : > { %3163 = vtanh.f32 %v1298_v14  ;;  %v1301_v9 = vmul.f32 0.7978846, %v1237_v36  ;;  %v1177_v63 = vmul.f32 0.044715, %v1113_v51  ;;  %v1397_v17 = vadd.f32 1.0, %v4179_v33 }
 0x205   : > { %v1302_v24 = vmul.f32 0.7978846, %v1238_v58  ;;  %v1114_v4 = vmul.f32 %v1050_v18, %v4319_v55  ;;  %v1466_v23 = vmul.f32 0.5, %v1402_v42  ;;  %v1526_v30 = vmul.f32 %v1462_v35, %v4069_v6 }
 0x206   : > { %3165 = vtanh.f32 %v1301_v9  ;;  %v1241_v53 = vadd.f32 %v1177_v63, %v4307_v47  ;;  %v1401_v57 = vadd.f32 1.0, %v4195_v31  ;;  %v1461_v50 = vmul.f32 0.5, %v1397_v17 }
 0x207   : > { %3167 = vtanh.f32 %v1302_v24  ;;  %v1178_v52 = vmul.f32 0.044715, %v1114_v4  ;;  %v1530_v44 = vmul.f32 %v1466_v23, %v4085_v34  ;;  %v4343_v20 = vadd.f32 %v4218_v8, %v3746_v56 }
 0x208   : > { %v1305_v33 = vmul.f32 0.7978846, %v1241_v53  ;;  %v1465_v59 = vmul.f32 0.5, %v1401_v57  ;;  %v1525_v14 = vmul.f32 %v1461_v50, %v4065_v41  ;;  %v4348_v6 = vadd.f32 %v4224_v61, %v3777_v32 }
 0x209   : > { %v4350_v36 = vpop.eup %3157  ;;  %v1242_v31 = vadd.f32 %v1178_v52, %v4319_v55  ;;  %v1586_v51 = vpack.c.bf16 %v1530_v44, %v1526_v30  ;;  %v1053_v34 = vmul.f32 %v4343_v20, %v4343_v20  ;;  %v4357_v8 = vadd.f32 %v4228_v7, %v3746_v56 }
 0x20a   : > { %3169 = vtanh.f32 %v1305_v33  ;;  %v1529_v58 = vmul.f32 %v1465_v59, %v4077_v29  ;;  %v1054_v41 = vmul.f32 %v4348_v6, %v4348_v6  ;;  %v4364_v61 = vadd.f32 %v4232_v49, %v3777_v32 }
 0x20b   : > { %v4366_v18 = vpop.eup %3159  ;;  %v1306_v42 = vmul.f32 0.7978846, %v1242_v31  ;;  %2162 = vmatprep.mubr.bf16.mxu0 %v1586_v51  ;;  %v1117_v35 = vmul.f32 %v1053_v34, %v4343_v20  ;;  %v1057_v7 = vmul.f32 %v4357_v8, %v4357_v8  ;;  %v1406_v9 = vadd.f32 1.0, %v4246_v10 }
 0x20c   : > { %v4372_v63 = vpop.eup %3161  ;;  %v1585_v29 = vpack.c.bf16 %v1529_v58, %v1525_v14  ;;  %v1118_v17 = vmul.f32 %v1054_v41, %v4348_v6  ;;  %v1058_v49 = vmul.f32 %v4364_v61, %v4364_v61  ;;  %v1410_v24 = vadd.f32 1.0, %v4268_v21 }
 0x20d   : > { %3171 = vtanh.f32 %v1306_v42  ;;  %v1181_v4 = vmul.f32 0.044715, %v1117_v35  ;;  %v1121_v23 = vmul.f32 %v1057_v7, %v4357_v8  ;;  %v1470_v30 = vmul.f32 0.5, %v1406_v9 }
 0x20e   : > { %v4379_v53 = vpop.eup %3163  ;;  %2163 = vmatmul.mubr.bf16.gmra.mrb[4].mxu0 %v1585_v29  ;;  %v1182_v57 = vmul.f32 0.044715, %v1118_v17  ;;  %v1122_v10 = vmul.f32 %v1058_v49, %v4364_v61  ;;  %v1474_v50 = vmul.f32 0.5, %v1410_v24  ;;  %v1405_v52 = vadd.f32 1.0, %v4234_v19 }
 0x20f   : > { %v1245_v44 = vadd.f32 %v1181_v4, %v4343_v20  ;;  %v1185_v33 = vmul.f32 0.044715, %v1121_v23  ;;  %v1534_v59 = vmul.f32 %v1470_v30, %v4127_v48  ;;  %v1409_v21 = vadd.f32 1.0, %v4261_v37 }
 0x210   : > { %v4386_v14 = vpop.eup %3165  ;;  %v1246_v31 = vadd.f32 %v1182_v57, %v4348_v6  ;;  %v1186_v51 = vmul.f32 0.044715, %v1122_v10  ;;  %v1538_v34 = vmul.f32 %v1474_v50, %v4148_v28  ;;  %v1469_v58 = vmul.f32 0.5, %v1405_v52 }
 0x211   : > { %v4390_v41 = vpop.eup %3167  ;;  %v1309_v42 = vmul.f32 0.7978846, %v1245_v44  ;;  %v1249_v19 = vadd.f32 %v1185_v33, %v4357_v8  ;;  %v1473_v35 = vmul.f32 0.5, %v1409_v21  ;;  %v4395_v7 = vadd.f32 %v4259_v39, %v3746_v56 }
 0x212   : > { %v1310_v48 = vmul.f32 0.7978846, %v1246_v31  ;;  %v1250_v37 = vadd.f32 %v1186_v51, %v4364_v61  ;;  %v1590_v9 = vpack.c.bf16 %v1538_v34, %v1534_v59  ;;  %v1533_v29 = vmul.f32 %v1469_v58, %v4115_v46 }
 0x213   : > { %3173 = vtanh.f32 %v1309_v42  ;;  %v1313_v17 = vmul.f32 0.7978846, %v1249_v19  ;;  %v1537_v28 = vmul.f32 %v1473_v35, %v4140_v38  ;;  %v1061_v49 = vmul.f32 %v4395_v7, %v4395_v7 }
 0x214   : > { %v4402_v24 = vpop.eup %3169  ;;  %3175 = vtanh.f32 %v1310_v48  ;;  %v1314_v4 = vmul.f32 0.7978846, %v1250_v37  ;;  %2172 = vmatprep.mubr.bf16.mxu0 %v1590_v9  ;;  %v4406_v39 = vadd.f32 %v4266_v1, %v3777_v32  ;;  %v4410_v23 = vadd.f32 %v4277_v0, %v3746_v56 }
 0x215   : > { %3177 = vtanh.f32 %v1313_v17  ;;  %v1589_v46 = vpack.c.bf16 %v1537_v28, %v1533_v29  ;;  %v1125_v38 = vmul.f32 %v1061_v49, %v4395_v7  ;;  %v4415_v30 = vadd.f32 %v4281_v12, %v3777_v32 }
 0x216   : > { %3179 = vtanh.f32 %v1314_v4  ;;  %v1062_v57 = vmul.f32 %v4406_v39, %v4406_v39  ;;  %v1065_v1 = vmul.f32 %v4410_v23, %v4410_v23  ;;  %v1414_v10 = vadd.f32 1.0, %v4315_v54 }
 0x217   : > { %v3172_v50 = vpop.eup %3171  ;;  %2173 = vmatmul.mubr.bf16.gmra.mrb[8].mxu0 %v1589_v46  ;;  %v1189_v56 = vmul.f32 0.044715, %v1125_v38  ;;  %v1066_v0 = vmul.f32 %v4415_v30, %v4415_v30  ;;  %v1418_v52 = vadd.f32 1.0, %v4329_v15  ;;  %v1413_v32 = vadd.f32 1.0, %v4310_v16 }
 0x218   : > { %v1126_v12 = vmul.f32 %v1062_v57, %v4406_v39  ;;  %v1129_v44 = vmul.f32 %v1065_v1, %v4410_v23  ;;  %v1478_v33 = vmul.f32 0.5, %v1414_v10  ;;  %v1417_v59 = vadd.f32 1.0, %v4322_v45 }
 0x219   : > { %v1253_v21 = vadd.f32 %v1189_v56, %v4395_v7  ;;  %v1130_v54 = vmul.f32 %v1066_v0, %v4415_v30  ;;  %v1482_v31 = vmul.f32 0.5, %v1418_v52  ;;  %v1477_v51 = vmul.f32 0.5, %v1413_v32 }
 0x21a   : > { %v1190_v34 = vmul.f32 0.044715, %v1126_v12  ;;  %v1193_v58 = vmul.f32 0.044715, %v1129_v44  ;;  %v1542_v42 = vmul.f32 %v1478_v33, %v4193_v43  ;;  %v1481_v15 = vmul.f32 0.5, %v1417_v59 }
 0x21b   : > { %v1317_v19 = vmul.f32 0.7978846, %v1253_v21  ;;  %v1194_v16 = vmul.f32 0.044715, %v1130_v54  ;;  %v1546_v35 = vmul.f32 %v1482_v31, %v4211_v26  ;;  %v1541_v48 = vmul.f32 %v1477_v51, %v4189_v22 }
 0x21c   : > { %v1254_v37 = vadd.f32 %v1190_v34, %v4406_v39  ;;  %v1257_v45 = vadd.f32 %v1193_v58, %v4410_v23  ;;  %v1545_v9 = vmul.f32 %v1481_v15, %v4207_v27  ;;  %v1422_v29 = vadd.f32 1.0, %v4366_v18 }
 0x21d   : > { %v3174_v17 = vpop.eup %3173  ;;  %3181 = vtanh.f32 %v1317_v19  ;;  %v1258_v28 = vadd.f32 %v1194_v16, %v4415_v30  ;;  %v1594_v43 = vpack.c.bf16 %v1546_v35, %v1542_v42  ;;  %v1426_v49 = vadd.f32 1.0, %v4379_v53 }
 0x21e   : > { %v3176_v4 = vpop.eup %3175  ;;  %v1318_v46 = vmul.f32 0.7978846, %v1254_v37  ;;  %v1321_v26 = vmul.f32 0.7978846, %v1257_v45  ;;  %v1593_v38 = vpack.c.bf16 %v1545_v9, %v1541_v48  ;;  %v1486_v22 = vmul.f32 0.5, %v1422_v29 }
 0x21f   : > { %v3178_v57 = vpop.eup %3177  ;;  %v1322_v1 = vmul.f32 0.7978846, %v1258_v28  ;;  %2182 = vmatprep.mubr.bf16.mxu0 %v1594_v43  ;;  %v1490_v10 = vmul.f32 0.5, %v1426_v49  ;;  %v1421_v27 = vadd.f32 1.0, %v4350_v36  ;;  %v1425_v18 = vadd.f32 1.0, %v4372_v63 }
 0x220   : > { %v3180_v56 = vpop.eup %3179  ;;  %3183 = vtanh.f32 %v1318_v46  ;;  %2183 = vmatmul.mubr.bf16.gmra.mrb[12].mxu0 %v1593_v38  ;;  %v1550_v0 = vmul.f32 %v1486_v22, %v4253_v25  ;;  %v1430_v53 = vadd.f32 1.0, %v4390_v41  ;;  %v1434_v52 = vadd.f32 1.0, %v3172_v50 }
 0x221   : > { %3185 = vtanh.f32 %v1321_v26  ;;  %v1554_v32 = vmul.f32 %v1490_v10, %v4274_v40  ;;  %v1485_v12 = vmul.f32 0.5, %v1421_v27  ;;  %v1489_v44 = vmul.f32 0.5, %v1425_v18  ;;  %v1675_v27 = vld [vmem:[%s4595_s4] sm:$0x3] }
 0x222   : > { %3187 = vtanh.f32 %v1322_v1  ;;  %v1494_v33 = vmul.f32 0.5, %v1430_v53  ;;  %v1498_v59 = vmul.f32 0.5, %v1434_v52  ;;  %v1429_v36 = vadd.f32 1.0, %v4386_v14  ;;  %v3190_v52 = vld [vmem:[%s3587_s14 + $0x8] sm:$0xff] }
 0x223   : > { %v1598_v21 = vpack.c.bf16 %v1554_v32, %v1550_v0  ;;  %v1549_v63 = vmul.f32 %v1485_v12, %v4242_v13  ;;  %v1553_v54 = vmul.f32 %v1489_v44, %v4257_v11  ;;  %v1433_v25 = vadd.f32 1.0, %v4402_v24 }
 0x224   : > { %v1558_v41 = vmul.f32 %v1494_v33, %v4293_v62  ;;  %v1562_v50 = vmul.f32 %v1498_v59, %v4319_v55  ;;  %v1493_v31 = vmul.f32 0.5, %v1429_v36  ;;  %v1438_v40 = vadd.f32 1.0, %v3176_v4 }
 0x225   : > { %2192 = vmatprep.mubr.bf16.mxu0 %v1598_v21  ;;  %v1597_v51 = vpack.c.bf16 %v1553_v54, %v1549_v63  ;;  %v1497_v34 = vmul.f32 0.5, %v1433_v25  ;;  %v1442_v58 = vadd.f32 1.0, %v3180_v56  ;;  %v1437_v42 = vadd.f32 1.0, %v3174_v17 }
 0x226   : > { %v1602_v15 = vpack.c.bf16 %v1562_v50, %v1558_v41  ;;  %v1502_v14 = vmul.f32 0.5, %v1438_v40  ;;  %v1441_v19 = vadd.f32 1.0, %v3178_v57  ;;  %v1557_v13 = vmul.f32 %v1493_v31, %v4288_v60  ;;  %v3191_v41 = vld [vmem:[%s3587_s14 + $0x10] sm:$0xff] }
 0x227   : > { %v3182_v16 = vpop.eup %3181  ;;  %v1561_v11 = vmul.f32 %v1497_v34, %v4307_v47  ;;  %v1506_v24 = vmul.f32 0.5, %v1442_v58  ;;  %v1501_v35 = vmul.f32 0.5, %v1437_v42  ;;  %v2235_v32 = vunpack.c.l.bf16 %v3190_v52  ;;  %v3192_v58 = vld [vmem:[%s3587_s14 + $0x18] sm:$0xff] }
 0x228   : > { %2193 = vmatmul.mubr.bf16.gmra.mrb[16].mxu0 %v1597_v51  ;;  %v1505_v62 = vmul.f32 0.5, %v1441_v19  ;;  %v1445_v55 = vadd.f32 1.0, %v3182_v16  ;;  %v1566_v37 = vmul.f32 %v1502_v14, %v4348_v6  ;;  %v2237_v50 = vunpack.c.l.bf16 %v3191_v41 }
 0x229   : > { %2202 = vmatprep.mubr.bf16.mxu0 %v1602_v15  ;;  %v1601_v48 = vpack.c.bf16 %v1561_v11, %v1557_v13  ;;  %v1570_v45 = vmul.f32 %v1506_v24, %v4364_v61  ;;  %v1565_v29 = vmul.f32 %v1501_v35, %v4343_v20  ;;  %v2238_v40 = vunpack.c.h.bf16 %v3191_v41 }
 0x22a   : > { %v3184_v9 = vpop.eup %3183  ;;  %v1569_v17 = vmul.f32 %v1505_v62, %v4357_v8  ;;  %v1509_v46 = vmul.f32 0.5, %v1445_v55  ;;  %v2239_v42 = vunpack.c.l.bf16 %v3192_v58  ;;  %v2240_v19 = vunpack.c.h.bf16 %v3192_v58 }
 0x22b   : > { %v3186_v28 = vpop.eup %3185  ;;  %v1606_v60 = vpack.c.bf16 %v1570_v45, %v1566_v37  ;;  %v1446_v43 = vadd.f32 1.0, %v3184_v9  ;;  %v3193_v45 = vld [vmem:[%s3587_s14 + $0x20] sm:$0xff] }
 0x22c   : > { %v3188_v47 = vpop.eup %3187  ;;  %v1605_v49 = vpack.c.bf16 %v1569_v17, %v1565_v29  ;;  %v1449_v4 = vadd.f32 1.0, %v3186_v28  ;;  %v1573_v6 = vmul.f32 %v1509_v46, %v4395_v7  ;;  %v4466_v7 = vrot.slane %v1675_v27, %v359_v3 }
 0x22d   : > { %v1450_v26 = vadd.f32 1.0, %v3188_v47  ;;  %v1510_v38 = vmul.f32 0.5, %v1446_v43  ;;  %v2236_v3 = vunpack.c.h.bf16 %v3190_v52  ;;  %v2241_v9 = vunpack.c.l.bf16 %v3193_v45  ;;  %v3194_v43 = vld [vmem:[%s3587_s14 + $0x28] sm:$0xff] }
 0x22e   : > { %v1513_v22 = vmul.f32 0.5, %v1449_v4  ;;  %v2242_v17 = vunpack.c.h.bf16 %v3193_v45  ;;  %v2243_v47 = vunpack.c.l.bf16 %v3194_v43  ;;  %v2244_v46 = vunpack.c.h.bf16 %v3194_v43 }
 0x22f   : > { %v1514_v57 = vmul.f32 0.5, %v1450_v26  ;;  %v1574_v20 = vmul.f32 %v1510_v38, %v4406_v39  ;;  %v3189_v39 = vld [vmem:[%s3587_s14] sm:$0xff] }
 0x230   : > { %2203 = vmatmul.mubr.bf16.gmra.mrb[20].mxu0 %v1601_v48  ;;  %v1577_v61 = vmul.f32 %v1513_v22, %v4410_v23  ;;  %v4470_v23 = vrot.slane %v1675_v27, %v363_v5  ;;  %v2233_v18 = vunpack.c.l.bf16 %v3189_v39  ;;  %v2234_v56 = vunpack.c.h.bf16 %v3189_v39 }
 0x231   : > { %2212 = vmatprep.mubr.bf16.mxu0 %v1606_v60  ;;  %v1578_v8 = vmul.f32 %v1514_v57, %v4415_v30 }
 0x232   : > { %v1609_v1 = vpack.c.bf16 %v1577_v61, %v1573_v6 }
 0x233   : > { %v1610_v10 = vpack.c.bf16 %v1578_v8, %v1574_v20 }
 0x238   : > { %2213 = vmatmul.mubr.bf16.gmra.mrb[24].mxu0 %v1605_v49 }
 0x239   : > { %2222 = vmatprep.mubr.bf16.mxu0 %v1610_v10  ;;  %v3195_v10 = vld [vmem:[%s3587_s14 + $0x30] sm:$0xff] }
 0x23a   : > { %v2245_v27 = vunpack.c.l.bf16 %v3195_v10 }
 0x240   : > { %2223 = vmatmul.mubr.bf16.gmra.mrb[28].mxu0 %v1609_v1 }
 0x2d5   : > { %v2154_v30 = vpop.f32.mrb[0].mxu0 }
 0x2d6   : > { %v2716_v0 = vadd.f32 %v2154_v30, %v4466_v7  ;;  %v2156_v53 = vpop.f32.mrb[1].mxu0 }
 0x2d7   : > { %v2717_v12 = vadd.f32 %v2156_v53, %v4470_v23  ;;  %v2158_v44 = vpop.f32.mrb[2].mxu0 }
 0x2d8   : > { %v2265_v33 = vadd.f32 %v2716_v0, %v2233_v18  ;;  %v2718_v2 = vadd.f32 %v2158_v44, %v4466_v7  ;;  %v2160_v5 = vpop.f32.mrb[3].mxu0  ;;  %v2246_v18 = vunpack.c.h.bf16 %v3195_v10  ;;  %v3196_v0 = vld [vmem:[%s3587_s14 + $0x38] sm:$0xff] }
 0x2d9   : > { %v2266_v59 = vadd.f32 %v2717_v12, %v2234_v56  ;;  %v2719_v36 = vadd.f32 %v2160_v5, %v4470_v23  ;;  %v2247_v53 = vunpack.c.l.bf16 %v3196_v0  ;;  %v2248_v12 = vunpack.c.h.bf16 %v3196_v0 }
 0x2da   : > { %v2267_v21 = vadd.f32 %v2718_v2, %v2235_v32 }
 0x2db   : > { %v2698_v63 = vpack.c.bf16 %v2266_v59, %v2265_v33  ;;  %v2268_v54 = vadd.f32 %v2719_v36, %v2236_v3 }
 0x2dd   : > { %2393 = vst [vmem:[%s4480_s10] sm:$0xff] %v2698_v63  ;;  %v2699_v25 = vpack.c.bf16 %v2268_v54, %v2267_v21  ;;  %v3197_v63 = vld [vmem:[%s3587_s14 + $0x40] sm:$0xff] }
 0x2de   : > { %v2249_v54 = vunpack.c.l.bf16 %v3197_v63 }
 0x2df   : > { %2394 = vst [vmem:[%s4480_s10 + $0x8] sm:$0xff] %v2699_v25 }
 0x2e1   : > { %v2164_v31 = vpop.f32.mrb[4].mxu0 }
 0x2e2   : > { %v2720_v51 = vadd.f32 %v2164_v31, %v4466_v7  ;;  %v2166_v34 = vpop.f32.mrb[5].mxu0 }
 0x2e3   : > { %v2721_v15 = vadd.f32 %v2166_v34, %v4470_v23  ;;  %v2168_v14 = vpop.f32.mrb[6].mxu0 }
 0x2e4   : > { %v2269_v16 = vadd.f32 %v2720_v51, %v2237_v50  ;;  %v2722_v13 = vadd.f32 %v2168_v14, %v4466_v7  ;;  %v2170_v11 = vpop.f32.mrb[7].mxu0  ;;  %v2250_v50 = vunpack.c.h.bf16 %v3197_v63  ;;  %v3198_v51 = vld [vmem:[%s3587_s14 + $0x48] sm:$0xff] }
 0x2e5   : > { %v2270_v24 = vadd.f32 %v2721_v15, %v2238_v40  ;;  %v2723_v35 = vadd.f32 %v2170_v11, %v4470_v23  ;;  %v2251_v34 = vunpack.c.l.bf16 %v3198_v51  ;;  %v2252_v15 = vunpack.c.h.bf16 %v3198_v51 }
 0x2e6   : > { %v2271_v62 = vadd.f32 %v2722_v13, %v2239_v42 }
 0x2e7   : > { %v2700_v55 = vpack.c.bf16 %v2270_v24, %v2269_v16  ;;  %v2272_v48 = vadd.f32 %v2723_v35, %v2240_v19 }
 0x2e9   : > { %2395 = vst [vmem:[%s4480_s10 + $0x10] sm:$0xff] %v2700_v55  ;;  %v2701_v37 = vpack.c.bf16 %v2272_v48, %v2271_v62  ;;  %v3199_v55 = vld [vmem:[%s3587_s14 + $0x50] sm:$0xff] }
 0x2ea   : > { %v2174_v29 = vpop.f32.mrb[8].mxu0  ;;  %v2253_v48 = vunpack.c.l.bf16 %v3199_v55 }
 0x2eb   : > { %2396 = vst [vmem:[%s4480_s10 + $0x18] sm:$0xff] %v2701_v37  ;;  %v2724_v28 = vadd.f32 %v2174_v29, %v4466_v7  ;;  %v2176_v60 = vpop.f32.mrb[9].mxu0 }
 0x2ec   : > { %v2725_v49 = vadd.f32 %v2176_v60, %v4470_v23  ;;  %v2178_v4 = vpop.f32.mrb[10].mxu0 }
 0x2ed   : > { %v2273_v26 = vadd.f32 %v2724_v28, %v2241_v9  ;;  %v2726_v38 = vadd.f32 %v2178_v4, %v4466_v7  ;;  %v2180_v22 = vpop.f32.mrb[11].mxu0  ;;  %v2254_v9 = vunpack.c.h.bf16 %v3199_v55  ;;  %v3200_v28 = vld [vmem:[%s3587_s14 + $0x58] sm:$0xff] }
 0x2ee   : > { %v2274_v57 = vadd.f32 %v2725_v49, %v2242_v17  ;;  %v2727_v6 = vadd.f32 %v2180_v22, %v4470_v23  ;;  %v2255_v60 = vunpack.c.l.bf16 %v3200_v28  ;;  %v2256_v49 = vunpack.c.h.bf16 %v3200_v28 }
 0x2ef   : > { %v2275_v61 = vadd.f32 %v2726_v38, %v2243_v47 }
 0x2f0   : > { %v2702_v20 = vpack.c.bf16 %v2274_v57, %v2273_v26  ;;  %v2276_v8 = vadd.f32 %v2727_v6, %v2244_v46 }
 0x2f2   : > { %2397 = vst [vmem:[%s4480_s10 + $0x20] sm:$0xff] %v2702_v20  ;;  %v2703_v1 = vpack.c.bf16 %v2276_v8, %v2275_v61  ;;  %v3201_v20 = vld [vmem:[%s3587_s14 + $0x60] sm:$0xff] }
 0x2f3   : > { %v2184_v39 = vpop.f32.mrb[12].mxu0  ;;  %v2257_v8 = vunpack.c.l.bf16 %v3201_v20 }
 0x2f4   : > { %2398 = vst [vmem:[%s4480_s10 + $0x28] sm:$0xff] %v2703_v1  ;;  %v2728_v30 = vadd.f32 %v2184_v39, %v4466_v7  ;;  %v2186_v56 = vpop.f32.mrb[13].mxu0 }
 0x2f5   : > { %v2729_v52 = vadd.f32 %v2186_v56, %v4470_v23  ;;  %v2188_v32 = vpop.f32.mrb[14].mxu0 }
 0x2f6   : > { %v2277_v44 = vadd.f32 %v2728_v30, %v2245_v27  ;;  %v2730_v3 = vadd.f32 %v2188_v32, %v4466_v7  ;;  %v2190_v33 = vpop.f32.mrb[15].mxu0  ;;  %v2258_v27 = vunpack.c.h.bf16 %v3201_v20  ;;  %v3202_v30 = vld [vmem:[%s3587_s14 + $0x68] sm:$0xff] }
 0x2f7   : > { %v2278_v2 = vadd.f32 %v2729_v52, %v2246_v18  ;;  %v2731_v5 = vadd.f32 %v2190_v33, %v4470_v23  ;;  %v2259_v56 = vunpack.c.l.bf16 %v3202_v30  ;;  %v2260_v52 = vunpack.c.h.bf16 %v3202_v30 }
 0x2f8   : > { %v2279_v59 = vadd.f32 %v2730_v3, %v2247_v53 }
 0x2f9   : > { %v2704_v36 = vpack.c.bf16 %v2278_v2, %v2277_v44  ;;  %v2280_v21 = vadd.f32 %v2731_v5, %v2248_v12 }
 0x2fb   : > { %2399 = vst [vmem:[%s4480_s10 + $0x30] sm:$0xff] %v2704_v36  ;;  %v2705_v25 = vpack.c.bf16 %v2280_v21, %v2279_v59  ;;  %v2194_v41 = vpop.f32.mrb[16].mxu0  ;;  %v3203_v36 = vld [vmem:[%s3587_s14 + $0x70] sm:$0xff] }
 0x2fc   : > { %v2732_v31 = vadd.f32 %v2194_v41, %v4466_v7  ;;  %v2196_v40 = vpop.f32.mrb[17].mxu0  ;;  %v2261_v21 = vunpack.c.l.bf16 %v3203_v36 }
 0x2fd   : > { %2400 = vst [vmem:[%s4480_s10 + $0x38] sm:$0xff] %v2705_v25  ;;  %v2733_v58 = vadd.f32 %v2196_v40, %v4470_v23  ;;  %v2198_v42 = vpop.f32.mrb[18].mxu0  ;;  %v2262_v25 = vunpack.c.h.bf16 %v3203_v36 }
 0x2fe   : > { %v2281_v14 = vadd.f32 %v2732_v31, %v2249_v54  ;;  %v2734_v19 = vadd.f32 %v2198_v42, %v4466_v7  ;;  %v2200_v16 = vpop.f32.mrb[19].mxu0  ;;  %v3204_v31 = vld [vmem:[%s3587_s14 + $0x78] sm:$0xff] }
 0x2ff   : > { %v2282_v13 = vadd.f32 %v2733_v58, %v2250_v50  ;;  %v2735_v11 = vadd.f32 %v2200_v16, %v4470_v23  ;;  %v2263_v40 = vunpack.c.l.bf16 %v3204_v31  ;;  %v2264_v58 = vunpack.c.h.bf16 %v3204_v31 }
 0x300   : > { %v2283_v24 = vadd.f32 %v2734_v19, %v2251_v34 }
 0x301   : > { %v2706_v35 = vpack.c.bf16 %v2282_v13, %v2281_v14  ;;  %v2284_v62 = vadd.f32 %v2735_v11, %v2252_v15 }
 0x303   : > { %2401 = vst [vmem:[%s4480_s10 + $0x40] sm:$0xff] %v2706_v35  ;;  %v2707_v37 = vpack.c.bf16 %v2284_v62, %v2283_v24  ;;  %v2204_v45 = vpop.f32.mrb[20].mxu0 }
 0x304   : > { %v2736_v29 = vadd.f32 %v2204_v45, %v4466_v7  ;;  %v2206_v17 = vpop.f32.mrb[21].mxu0 }
 0x305   : > { %2402 = vst [vmem:[%s4480_s10 + $0x48] sm:$0xff] %v2707_v37  ;;  %v2737_v43 = vadd.f32 %v2206_v17, %v4470_v23  ;;  %v2208_v47 = vpop.f32.mrb[22].mxu0 }
 0x306   : > { %v2285_v4 = vadd.f32 %v2736_v29, %v2253_v48  ;;  %v2738_v46 = vadd.f32 %v2208_v47, %v4466_v7  ;;  %v2210_v26 = vpop.f32.mrb[23].mxu0 }
 0x307   : > { %v2286_v38 = vadd.f32 %v2737_v43, %v2254_v9  ;;  %v2739_v22 = vadd.f32 %v2210_v26, %v4470_v23 }
 0x308   : > { %v2287_v57 = vadd.f32 %v2738_v46, %v2255_v60 }
 0x309   : > { %v2708_v6 = vpack.c.bf16 %v2286_v38, %v2285_v4  ;;  %v2288_v61 = vadd.f32 %v2739_v22, %v2256_v49 }
 0x30b   : > { %2403 = vst [vmem:[%s4480_s10 + $0x50] sm:$0xff] %v2708_v6  ;;  %v2709_v1 = vpack.c.bf16 %v2288_v61, %v2287_v57  ;;  %v2214_v10 = vpop.f32.mrb[24].mxu0 }
 0x30c   : > { %v2740_v39 = vadd.f32 %v2214_v10, %v4466_v7  ;;  %v2216_v18 = vpop.f32.mrb[25].mxu0 }
 0x30d   : > { %2404 = vst [vmem:[%s4480_s10 + $0x58] sm:$0xff] %v2709_v1  ;;  %v2741_v0 = vadd.f32 %v2216_v18, %v4470_v23  ;;  %v2218_v53 = vpop.f32.mrb[26].mxu0 }
 0x30e   : > { %v2289_v32 = vadd.f32 %v2740_v39, %v2257_v8  ;;  %v2742_v12 = vadd.f32 %v2218_v53, %v4466_v7  ;;  %v2220_v44 = vpop.f32.mrb[27].mxu0 }
 0x30f   : > { %v2290_v3 = vadd.f32 %v2741_v0, %v2258_v27  ;;  %v2743_v33 = vadd.f32 %v2220_v44, %v4470_v23 }
 0x310   : > { %v2291_v2 = vadd.f32 %v2742_v12, %v2259_v56 }
 0x311   : > { %v2710_v5 = vpack.c.bf16 %v2290_v3, %v2289_v32  ;;  %v2292_v59 = vadd.f32 %v2743_v33, %v2260_v52 }
 0x313   : > { %2405 = vst [vmem:[%s4480_s10 + $0x60] sm:$0xff] %v2710_v5  ;;  %v2711_v63 = vpack.c.bf16 %v2292_v59, %v2291_v2  ;;  %v2224_v54 = vpop.f32.mrb[28].mxu0 }
 0x314   : > { %v2744_v41 = vadd.f32 %v2224_v54, %v4466_v7  ;;  %v2226_v50 = vpop.f32.mrb[29].mxu0 }
 0x315   : > { %2406 = vst [vmem:[%s4480_s10 + $0x68] sm:$0xff] %v2711_v63  ;;  %v2745_v51 = vadd.f32 %v2226_v50, %v4470_v23  ;;  %v2228_v34 = vpop.f32.mrb[30].mxu0 }
 0x316   : > { %v2293_v42 = vadd.f32 %v2744_v41, %v2261_v21  ;;  %v2746_v15 = vadd.f32 %v2228_v34, %v4466_v7  ;;  %v2230_v14 = vpop.f32.mrb[31].mxu0 }
 0x317   : > { %v2294_v19 = vadd.f32 %v2745_v51, %v2262_v25  ;;  %v2747_v16 = vadd.f32 %v2230_v14, %v4470_v23 }
 0x318   : > { %v2295_v13 = vadd.f32 %v2746_v15, %v2263_v40 }
 0x319   : > { %v2712_v11 = vpack.c.bf16 %v2294_v19, %v2293_v42  ;;  %v2296_v24 = vadd.f32 %v2747_v16, %v2264_v58 }
 0x31b   : > { %2407 = vst [vmem:[%s4480_s10 + $0x70] sm:$0xff] %v2712_v11  ;;  %v2713_v7 = vpack.c.bf16 %v2296_v24, %v2295_v13 }
 0x31d   : > { %2408 = vst [vmem:[%s4480_s10 + $0x78] sm:$0xff] %v2713_v7 }
 0x31e   : > { %3304 = shalt.err (!%p3301_p2)
}
 0x31f   : > { %s3305_s14 = scalar_lea.hbm %s4543_s11, 2048  ;;  %s3309_s12 = scalar_lea.hbm %s4596_s5, 4096 }
 0x320   : > { %p3306_p13 = scmp.ne.s32.totalorder %s4543_s11, %s3305_s14  ;;  %p3310_p4 = scmp.lt.u32.totalorder %s4543_s11, %s4596_s5 }
 0x321   : > { %p3311_p7 = scmp.lt.u32.totalorder %s3309_s12, %s3305_s14  ;;  %p3313_p11 = scmp.lt.u32.totalorder %s3305_s14, %s4543_s11 }
 0x322   : > { %p3307_p6 = pnand %p3306_p13, %p4610_p0 }
 0x323   : > { %p3312_p8 = por %p3311_p7, %p3310_p4 }
 0x324   : > { %p3308_p10 = pneg %p3307_p6 }
 0x325   : > { %p3314_p1 = por %p3313_p11, %p3312_p8 }
 0x327   : > { %p3315_p3 = pnand %p3314_p1, %p3308_p10 }
 0x329   : > { %3318 = shalt.err (!%p3315_p3)
}
 0x32a   : > { %s3371_s28 = smov 128   ;;  %s3372_s9 = smov 8  }
 0x32b   : > { %2790 = dma.vmem_to_hbm [thread:$0]  (%p4610_p0), %s4545_s15, 2048, %s4543_s11, %s2410_s23, %s3371_s28, %s3371_s28, %s3372_s9  }
 0x32c PF: > { %s2439_s30 = sand.u32 1, %s3349_s18   ;;  %p4611_p5 = scmp.ne.s32.totalorder %s4601_s25, 0 }
 0x32d   : > { %p4612_p9 = scmp.ge.s32.totalorder %s3361_s21, 2  ;;  %s2440_s7 = scalar_lea.sflag [#allocation4], %s2439_s30 }
 0x32f   : > { %p2804_p12 = pnand %p4612_p9, %p4611_p5 }
 0x331   : > { %3344 = dma.done.wait (!%p2804_p12), %s2440_s7, 2048  }
 0x332   : > { %3346 = vsyncadd (!%p2804_p12), %s2440_s7, 4294965248  ;;  %p19_p2 = scmp.ge.s32.totalorder %s3516_s16, 4   ;;  %s4613_s18 = smov %s3353_s19 }
 0x333   : > { %s4614_s19 = smov %s3357_s20  ;;  %s4615_s20 = smov %s3525_s27 }
 0x334   : > { %s4616_s21 = smov %s3516_s16  ;;  %21 = sbr.rel (!%p19_p2) target bundleno = 6 (0x6), region = 93 }
 0x33b   :  { %2445 = vsyncpa [#allocation3], 1 }
 0x33c   :  { %2447 = vsyncpa [#allocation3 + $0x1], 1 }
 0x33d   :  { %2448 = vsyncpa [#allocation6], 1 }
 0x33e   :  { %2449 = vsyncpa [#allocation4], 1 }
 0x33f   :  { %2451 = vsyncpa [#allocation4 + $0x1], 1 }

</bundles_post_ra>
